<compile_context>
chip_gen: v5e
topology: v5e:2x2
jax: 0.10.0
libtpu: 0.0.40
codegen_flags: <defaults>
</compile_context>

<pallas_src>
import functools
import math

import jax
import jax.numpy as jnp
from jax.experimental import pallas as pl
from jax.experimental.pallas import tpu as pltpu

SQRT_HALF = math.sqrt(0.5)
BN_EPS = 1e-5
LANE = 128          # pad every matmul K / N dim (and the output) to lane width


# ----------------------------- shared math -------------------------------- #
def _batchnorm_train(x):
    # torch.nn.BatchNorm1d in training mode, weight=1, bias=0 (biased var).
    # Zero-padded columns stay exactly zero: (0 - 0) * rsqrt(0 + eps) == 0.
    mean = jnp.mean(x, axis=0, keepdims=True)
    var = jnp.mean((x - mean) ** 2, axis=0, keepdims=True)
    return (x - mean) * jax.lax.rsqrt(var + BN_EPS)


# ------------------------------- kernel ------------------------------------ #
def tabnet_encoder_kernel(x_ref,
                          ws0l_ref, ws0g_ref, ws1l_ref, ws1g_ref,
                          wd0l_ref, wd0g_ref, wd1l_ref, wd1g_ref,
                          wattn_ref, linw_ref, linb_ref,
                          out_ref, *, num_layers, feat_in, gamma):
    x = _batchnorm_train(x_ref[...])                        # (B, LANE) f32

    # Valid-lane mask (real feature columns) for softmax / prior; hoisted once.
    lane_id = jax.lax.broadcasted_iota(jnp.int32, (1, x.shape[-1]), 1)
    valid = jnp.broadcast_to((lane_id < feat_in).astype(jnp.float32), x.shape)

    def glu(h, wl_ref, wg_ref, t):
        # Split GLU: two clean 128-wide matmuls (bf16 in, f32 acc), no slicing.
        hb = h.astype(jnp.bfloat16)
        lin = jnp.dot(hb, wl_ref[t], preferred_element_type=jnp.float32)
        gate = jax.nn.sigmoid(jnp.dot(hb, wg_ref[t],
                                      preferred_element_type=jnp.float32))
        return lin * gate

    def feat_transformer(h, t):
        # shared GLUBlock (no first residual) + dependent GLUBlock (residuals)
        h = glu(h, ws0l_ref, ws0g_ref, t)
        h = h * SQRT_HALF + glu(h, ws1l_ref, ws1g_ref, t)
        h = h * SQRT_HALF + glu(h, wd0l_ref, wd0g_ref, t)
        h = h * SQRT_HALF + glu(h, wd1l_ref, wd1g_ref, t)
        return h

    prior = valid                       # 1 on real feature lanes, 0 on padding
    # Full output slab; the att half is consumed via wattn's row-offset padding.
    out_t = feat_transformer(x, 0)
    feat_sum = jnp.zeros_like(x)

    for i in range(num_layers):                             # static unroll
        # AttentiveTransformer: Linear(no bias) -> GhostBN -> prior* -> softmax
        a = jnp.dot(out_t.astype(jnp.bfloat16), wattn_ref[i],
                    preferred_element_type=jnp.float32)
        a = _batchnorm_train(a)                             # 0 in padded lanes
        logits = prior * a
        m = jnp.max(logits, axis=-1, keepdims=True)         # >= real max (pads=0)
        e = jnp.exp(logits - m) * valid                     # drop padded lanes
        denom = jnp.sum(e, axis=-1, keepdims=True)
        mask = e * pl.reciprocal(denom, approx=True)        # EUP, not VALU divide

        out_t = feat_transformer(mask * x, i + 1)
        # ReLU over the whole slab; att / padded lanes are killed by lin_w's
        # zero rows in the final projection, so no lane slicing is required.
        feat_sum = feat_sum + jnp.maximum(out_t, 0.0)
        prior = (gamma - mask) * prior

    out_ref[...] = (jnp.dot(feat_sum.astype(jnp.bfloat16), linw_ref[...],
                            preferred_element_type=jnp.float32)
                    + linb_ref[...])


# --------------------------- parameter packing ------------------------------ #
def _pad_last2(w, rows, cols, r0=0, c0=0, dtype=jnp.bfloat16):
    """Zero-pad the last two dims of w into a (rows, cols) slab at (r0, c0)."""
    pad = [(0, 0)] * (w.ndim - 2) + [(r0, rows - r0 - w.shape[-2]),
                                     (c0, cols - c0 - w.shape[-1])]
    return jnp.pad(w, pad).astype(dtype)


def prepare_kernel_params(params, *, split_feat, split_attn):
    s = split_feat + split_attn

    def split_glu(w):                   # (T, K, 2s) -> lin / gate (T, LANE, LANE)
        return (_pad_last2(w[..., :s], LANE, LANE),
                _pad_last2(w[..., s:], LANE, LANE))

    ws0l, ws0g = split_glu(params["ws0"])
    ws1l, ws1g = split_glu(params["ws1"])
    wd0l, wd0g = split_glu(params["wd0"])
    wd1l, wd1g = split_glu(params["wd1"])
    # Attention weight rows land on the att lanes of the transformer output.
    wattn = _pad_last2(params["wattn"], LANE, LANE, r0=split_feat)
    lin_w = _pad_last2(params["lin_w"], LANE, LANE)   # rows >= split_feat are 0
    lin_b = _pad_last2(params["lin_b"], 1, LANE, dtype=jnp.float32)
    return (ws0l, ws0g, ws1l, ws1g, wd0l, wd0g, wd1l, wd1g, wattn, lin_w, lin_b)


# ------------------------------- wrapper ----------------------------------- #
def tabnet_encoder(x, params, *, num_layers, split_feat, split_attn, gamma):
    batch = x.shape[0]
    feat_in = math.prod(x.shape[1:])
    assert feat_in <= LANE and split_feat + split_attn <= LANE
    x2d = x.reshape(batch, feat_in).astype(jnp.float32)
    x_pad = jnp.pad(x2d, ((0, 0), (0, LANE - feat_in)))     # lane-dense input
    kparams = prepare_kernel_params(params, split_feat=split_feat,
                                    split_attn=split_attn)
    out_channels = params["lin_b"].shape[-1]

    kern = functools.partial(tabnet_encoder_kernel, num_layers=num_layers,
                             feat_in=feat_in, gamma=gamma)
    vmem = pl.BlockSpec(memory_space=pltpu.MemorySpace.VMEM)
    out_pad = pl.pallas_call(
        kern,
        out_shape=jax.ShapeDtypeStruct((batch, LANE), jnp.float32),
        in_specs=[vmem] * 12,
        out_specs=vmem,
    )(x_pad, *kparams)
    return out_pad[:, :out_channels]                        # slice lane padding


# -------------------------- pure-JAX reference ----------------------------- #
def _glu_layer_ref(x, w):
    h = x @ w
    s = h.shape[-1] // 2
    return h[:, :s] * jax.nn.sigmoid(h[:, s:])


def _feat_transformer_ref(h, ws0, ws1, wd0, wd1):
    h = _glu_layer_ref(h, ws0)
    h = h * SQRT_HALF + _glu_layer_ref(h, ws1)
    h = h * SQRT_HALF + _glu_layer_ref(h, wd0)
    h = h * SQRT_HALF + _glu_layer_ref(h, wd1)
    return h


def reference_forward(x, params, *, num_layers, split_feat, gamma):
    batch = x.shape[0]
    h = x.reshape(batch, -1).astype(jnp.float32)
    h = _batchnorm_train(h)

    prior = jnp.ones_like(h)
    att = _feat_transformer_ref(h, params["ws0"][0], params["ws1"][0],
                                params["wd0"][0], params["wd1"][0])[:, split_feat:]
    feat_sum = jnp.zeros((batch, split_feat), jnp.float32)
    for i in range(num_layers):
        a = _batchnorm_train(att @ params["wattn"][i])
        mask = jax.nn.softmax(prior * a, axis=-1)
        out = _feat_transformer_ref(mask * h, params["ws0"][i + 1],
                                    params["ws1"][i + 1], params["wd0"][i + 1],
                                    params["wd1"][i + 1])
        feat_sum = feat_sum + jnp.maximum(out[:, :split_feat], 0.0)
        att = out[:, split_feat:]
        prior = (gamma - mask) * prior
    return feat_sum @ params["lin_w"] + params["lin_b"]


# ------------------------------ parameters --------------------------------- #
def init_params(key, *, channels, num_cols, num_layers, split_feat,
                split_attn, out_channels):
    feat_in = channels * num_cols                 # in_channels
    s = split_feat + split_attn                   # feature-transformer width
    t = num_layers + 1
    ks = jax.random.split(key, 7)

    def unif(k, shape, fan_in):
        b = 1.0 / math.sqrt(fan_in)
        return jax.random.uniform(k, shape, jnp.float32, -b, b)

    return dict(
        # GLU layer weights stored as (in, 2*out) for x @ W.
        ws0=unif(ks[0], (t, feat_in, 2 * s), feat_in),   # shared layer 0
        ws1=unif(ks[1], (t, s, 2 * s), s),               # shared layer 1
        wd0=unif(ks[2], (t, s, 2 * s), s),               # dependent layer 0
        wd1=unif(ks[3], (t, s, 2 * s), s),               # dependent layer 1
        wattn=unif(ks[4], (num_layers, split_attn, feat_in), split_attn),
        lin_w=unif(ks[5], (split_feat, out_channels), split_feat),
        lin_b=unif(ks[6], (1, out_channels), split_feat),
    )


# --------------------------------- main ------------------------------------ #
if __name__ == "__main__":
    channels, num_cols = 4, 8          # -> in_channels = 32
    batch = 16
    split_feat, split_attn = 16, 16
    num_layers = 2
    out_channels = 8
    gamma = 1.2

    key = jax.random.PRNGKey(0)
    kx, kp = jax.random.split(key)
    x = jax.random.normal(kx, (batch, num_cols, channels), jnp.float32)
    params = init_params(kp, channels=channels, num_cols=num_cols,
                         num_layers=num_layers, split_feat=split_feat,
                         split_attn=split_attn, out_channels=out_channels)

    out = tabnet_encoder(x, params, num_layers=num_layers,
                         split_feat=split_feat, split_attn=split_attn,
                         gamma=gamma)
    out = jax.block_until_ready(out)

    ref = reference_forward(x, params, num_layers=num_layers,
                            split_feat=split_feat, gamma=gamma)
    assert out.shape == (batch, out_channels)
    # bf16 MXU inputs + approx reciprocal vs an all-f32 reference.
    assert jnp.allclose(out, ref, atol=3e-2, rtol=3e-2), "mismatch vs reference"
    print("KERNEL_OK")
</pallas_src>

<mosaic_0001>
module attributes {stable_mosaic.version = 11 : i64} {
  func.func @tabnet_encoder_kernel(%arg0: memref<16x128xf32, #tpu.memory_space<vmem>>, %arg1: memref<3x128x128xbf16, #tpu.memory_space<vmem>>, %arg2: memref<3x128x128xbf16, #tpu.memory_space<vmem>>, %arg3: memref<3x128x128xbf16, #tpu.memory_space<vmem>>, %arg4: memref<3x128x128xbf16, #tpu.memory_space<vmem>>, %arg5: memref<3x128x128xbf16, #tpu.memory_space<vmem>>, %arg6: memref<3x128x128xbf16, #tpu.memory_space<vmem>>, %arg7: memref<3x128x128xbf16, #tpu.memory_space<vmem>>, %arg8: memref<3x128x128xbf16, #tpu.memory_space<vmem>>, %arg9: memref<2x128x128xbf16, #tpu.memory_space<vmem>>, %arg10: memref<128x128xbf16, #tpu.memory_space<vmem>>, %arg11: memref<1x128xf32, #tpu.memory_space<vmem>>, %arg12: memref<16x128xf32, #tpu.memory_space<vmem>>) attributes {dimension_semantics = [], scalar_prefetch = 0 : i64, scratch_operands = 0 : i64, tpu.core_type = #tpu.core_type<tc>} {
    %c0 = arith.constant 0 : index
    %c0_0 = arith.constant 0 : index
    %0 = vector.load %arg0[%c0, %c0_0] : memref<16x128xf32, #tpu.memory_space<vmem>>, vector<16x128xf32>
    %cst = arith.constant dense<0.000000e+00> : vector<128xf32>
    %1 = vector.multi_reduction <add>, %0, %cst [0] : vector<16x128xf32> to vector<128xf32>
    %2 = vector.shape_cast %1 : vector<128xf32> to vector<1x128xf32>
    %cst_1 = arith.constant 1.600000e+01 : f32
    %3 = vector.broadcast %cst_1 : f32 to vector<1x128xf32>
    %4 = arith.divf %2, %3 : vector<1x128xf32>
    %5 = vector.broadcast %4 : vector<1x128xf32> to vector<16x128xf32>
    %6 = arith.subf %0, %5 : vector<16x128xf32>
    %7 = arith.mulf %6, %6 : vector<16x128xf32>
    %cst_2 = arith.constant dense<0.000000e+00> : vector<128xf32>
    %8 = vector.multi_reduction <add>, %7, %cst_2 [0] : vector<16x128xf32> to vector<128xf32>
    %9 = vector.shape_cast %8 : vector<128xf32> to vector<1x128xf32>
    %cst_3 = arith.constant 1.600000e+01 : f32
    %10 = vector.broadcast %cst_3 : f32 to vector<1x128xf32>
    %11 = arith.divf %9, %10 : vector<1x128xf32>
    %12 = vector.broadcast %4 : vector<1x128xf32> to vector<16x128xf32>
    %13 = arith.subf %0, %12 : vector<16x128xf32>
    %cst_4 = arith.constant 9.99999974E-6 : f32
    %14 = vector.broadcast %cst_4 : f32 to vector<1x128xf32>
    %15 = arith.addf %11, %14 : vector<1x128xf32>
    %16 = math.rsqrt %15 : vector<1x128xf32>
    %17 = vector.broadcast %16 : vector<1x128xf32> to vector<16x128xf32>
    %18 = arith.mulf %13, %17 : vector<16x128xf32>
    %19 = tpu.iota {dimensions = array<i32: 1>} : vector<1x128xi32>
    %c32_i32 = arith.constant 32 : i32
    %20 = vector.broadcast %c32_i32 : i32 to vector<1x128xi32>
    %21 = arith.cmpi slt, %19, %20 : vector<1x128xi32>
    %22 = arith.extui %21 : vector<1x128xi1> to vector<1x128xi32>
    %23 = arith.sitofp %22 : vector<1x128xi32> to vector<1x128xf32>
    %24 = vector.shape_cast %23 : vector<1x128xf32> to vector<1x128xf32>
    %25 = vector.broadcast %24 : vector<1x128xf32> to vector<16x128xf32>
    %26 = arith.truncf %18 : vector<16x128xf32> to vector<16x128xbf16>
    %c0_5 = arith.constant 0 : index
    %c0_6 = arith.constant 0 : index
    %c0_7 = arith.constant 0 : index
    %27 = vector.load %arg1[%c0_5, %c0_6, %c0_7] : memref<3x128x128xbf16, #tpu.memory_space<vmem>>, vector<1x128x128xbf16>
    %28 = vector.shape_cast %27 : vector<1x128x128xbf16> to vector<128x128xbf16>
    %cst_8 = arith.constant dense<0.000000e+00> : vector<16x128xf32>
    %29 = tpu.matmul %26, %28, %cst_8 {dimension_numbers = #tpu.dot_dimension_numbers<[1], [0], [0], [1], [0, 0, 1, 1], [], []>} : vector<16x128xbf16>, vector<128x128xbf16>, vector<16x128xf32> -> vector<16x128xf32>
    %c0_9 = arith.constant 0 : index
    %c0_10 = arith.constant 0 : index
    %c0_11 = arith.constant 0 : index
    %30 = vector.load %arg2[%c0_9, %c0_10, %c0_11] : memref<3x128x128xbf16, #tpu.memory_space<vmem>>, vector<1x128x128xbf16>
    %31 = vector.shape_cast %30 : vector<1x128x128xbf16> to vector<128x128xbf16>
    %cst_12 = arith.constant dense<0.000000e+00> : vector<16x128xf32>
    %32 = tpu.matmul %26, %31, %cst_12 {dimension_numbers = #tpu.dot_dimension_numbers<[1], [0], [0], [1], [0, 0, 1, 1], [], []>} : vector<16x128xbf16>, vector<128x128xbf16>, vector<16x128xf32> -> vector<16x128xf32>
    %33 = arith.negf %32 : vector<16x128xf32>
    %34 = math.exp %33 : vector<16x128xf32>
    %cst_13 = arith.constant 1.000000e+00 : f32
    %35 = vector.broadcast %cst_13 : f32 to vector<16x128xf32>
    %36 = arith.addf %35, %34 : vector<16x128xf32>
    %37 = arith.divf %35, %36 : vector<16x128xf32>
    %38 = arith.mulf %29, %37 : vector<16x128xf32>
    %cst_14 = arith.constant 0.707106769 : f32
    %39 = vector.broadcast %cst_14 : f32 to vector<16x128xf32>
    %40 = arith.mulf %38, %39 : vector<16x128xf32>
    %41 = arith.truncf %38 : vector<16x128xf32> to vector<16x128xbf16>
    %c0_15 = arith.constant 0 : index
    %c0_16 = arith.constant 0 : index
    %c0_17 = arith.constant 0 : index
    %42 = vector.load %arg3[%c0_15, %c0_16, %c0_17] : memref<3x128x128xbf16, #tpu.memory_space<vmem>>, vector<1x128x128xbf16>
    %43 = vector.shape_cast %42 : vector<1x128x128xbf16> to vector<128x128xbf16>
    %cst_18 = arith.constant dense<0.000000e+00> : vector<16x128xf32>
    %44 = tpu.matmul %41, %43, %cst_18 {dimension_numbers = #tpu.dot_dimension_numbers<[1], [0], [0], [1], [0, 0, 1, 1], [], []>} : vector<16x128xbf16>, vector<128x128xbf16>, vector<16x128xf32> -> vector<16x128xf32>
    %c0_19 = arith.constant 0 : index
    %c0_20 = arith.constant 0 : index
    %c0_21 = arith.constant 0 : index
    %45 = vector.load %arg4[%c0_19, %c0_20, %c0_21] : memref<3x128x128xbf16, #tpu.memory_space<vmem>>, vector<1x128x128xbf16>
    %46 = vector.shape_cast %45 : vector<1x128x128xbf16> to vector<128x128xbf16>
    %cst_22 = arith.constant dense<0.000000e+00> : vector<16x128xf32>
    %47 = tpu.matmul %41, %46, %cst_22 {dimension_numbers = #tpu.dot_dimension_numbers<[1], [0], [0], [1], [0, 0, 1, 1], [], []>} : vector<16x128xbf16>, vector<128x128xbf16>, vector<16x128xf32> -> vector<16x128xf32>
    %48 = arith.negf %47 : vector<16x128xf32>
    %49 = math.exp %48 : vector<16x128xf32>
    %cst_23 = arith.constant 1.000000e+00 : f32
    %50 = vector.broadcast %cst_23 : f32 to vector<16x128xf32>
    %51 = arith.addf %50, %49 : vector<16x128xf32>
    %52 = arith.divf %50, %51 : vector<16x128xf32>
    %53 = arith.mulf %44, %52 : vector<16x128xf32>
    %54 = arith.addf %40, %53 : vector<16x128xf32>
    %cst_24 = arith.constant 0.707106769 : f32
    %55 = vector.broadcast %cst_24 : f32 to vector<16x128xf32>
    %56 = arith.mulf %54, %55 : vector<16x128xf32>
    %57 = arith.truncf %54 : vector<16x128xf32> to vector<16x128xbf16>
    %c0_25 = arith.constant 0 : index
    %c0_26 = arith.constant 0 : index
    %c0_27 = arith.constant 0 : index
    %58 = vector.load %arg5[%c0_25, %c0_26, %c0_27] : memref<3x128x128xbf16, #tpu.memory_space<vmem>>, vector<1x128x128xbf16>
    %59 = vector.shape_cast %58 : vector<1x128x128xbf16> to vector<128x128xbf16>
    %cst_28 = arith.constant dense<0.000000e+00> : vector<16x128xf32>
    %60 = tpu.matmul %57, %59, %cst_28 {dimension_numbers = #tpu.dot_dimension_numbers<[1], [0], [0], [1], [0, 0, 1, 1], [], []>} : vector<16x128xbf16>, vector<128x128xbf16>, vector<16x128xf32> -> vector<16x128xf32>
    %c0_29 = arith.constant 0 : index
    %c0_30 = arith.constant 0 : index
    %c0_31 = arith.constant 0 : index
    %61 = vector.load %arg6[%c0_29, %c0_30, %c0_31] : memref<3x128x128xbf16, #tpu.memory_space<vmem>>, vector<1x128x128xbf16>
    %62 = vector.shape_cast %61 : vector<1x128x128xbf16> to vector<128x128xbf16>
    %cst_32 = arith.constant dense<0.000000e+00> : vector<16x128xf32>
    %63 = tpu.matmul %57, %62, %cst_32 {dimension_numbers = #tpu.dot_dimension_numbers<[1], [0], [0], [1], [0, 0, 1, 1], [], []>} : vector<16x128xbf16>, vector<128x128xbf16>, vector<16x128xf32> -> vector<16x128xf32>
    %64 = arith.negf %63 : vector<16x128xf32>
    %65 = math.exp %64 : vector<16x128xf32>
    %cst_33 = arith.constant 1.000000e+00 : f32
    %66 = vector.broadcast %cst_33 : f32 to vector<16x128xf32>
    %67 = arith.addf %66, %65 : vector<16x128xf32>
    %68 = arith.divf %66, %67 : vector<16x128xf32>
    %69 = arith.mulf %60, %68 : vector<16x128xf32>
    %70 = arith.addf %56, %69 : vector<16x128xf32>
    %cst_34 = arith.constant 0.707106769 : f32
    %71 = vector.broadcast %cst_34 : f32 to vector<16x128xf32>
    %72 = arith.mulf %70, %71 : vector<16x128xf32>
    %73 = arith.truncf %70 : vector<16x128xf32> to vector<16x128xbf16>
    %c0_35 = arith.constant 0 : index
    %c0_36 = arith.constant 0 : index
    %c0_37 = arith.constant 0 : index
    %74 = vector.load %arg7[%c0_35, %c0_36, %c0_37] : memref<3x128x128xbf16, #tpu.memory_space<vmem>>, vector<1x128x128xbf16>
    %75 = vector.shape_cast %74 : vector<1x128x128xbf16> to vector<128x128xbf16>
    %cst_38 = arith.constant dense<0.000000e+00> : vector<16x128xf32>
    %76 = tpu.matmul %73, %75, %cst_38 {dimension_numbers = #tpu.dot_dimension_numbers<[1], [0], [0], [1], [0, 0, 1, 1], [], []>} : vector<16x128xbf16>, vector<128x128xbf16>, vector<16x128xf32> -> vector<16x128xf32>
    %c0_39 = arith.constant 0 : index
    %c0_40 = arith.constant 0 : index
    %c0_41 = arith.constant 0 : index
    %77 = vector.load %arg8[%c0_39, %c0_40, %c0_41] : memref<3x128x128xbf16, #tpu.memory_space<vmem>>, vector<1x128x128xbf16>
    %78 = vector.shape_cast %77 : vector<1x128x128xbf16> to vector<128x128xbf16>
    %cst_42 = arith.constant dense<0.000000e+00> : vector<16x128xf32>
    %79 = tpu.matmul %73, %78, %cst_42 {dimension_numbers = #tpu.dot_dimension_numbers<[1], [0], [0], [1], [0, 0, 1, 1], [], []>} : vector<16x128xbf16>, vector<128x128xbf16>, vector<16x128xf32> -> vector<16x128xf32>
    %80 = arith.negf %79 : vector<16x128xf32>
    %81 = math.exp %80 : vector<16x128xf32>
    %cst_43 = arith.constant 1.000000e+00 : f32
    %82 = vector.broadcast %cst_43 : f32 to vector<16x128xf32>
    %83 = arith.addf %82, %81 : vector<16x128xf32>
    %84 = arith.divf %82, %83 : vector<16x128xf32>
    %85 = arith.mulf %76, %84 : vector<16x128xf32>
    %86 = arith.addf %72, %85 : vector<16x128xf32>
    %cst_44 = arith.constant 0.000000e+00 : f32
    %87 = vector.broadcast %cst_44 : f32 to vector<16x128xf32>
    %88 = arith.truncf %86 : vector<16x128xf32> to vector<16x128xbf16>
    %c0_45 = arith.constant 0 : index
    %c0_46 = arith.constant 0 : index
    %c0_47 = arith.constant 0 : index
    %89 = vector.load %arg9[%c0_45, %c0_46, %c0_47] : memref<2x128x128xbf16, #tpu.memory_space<vmem>>, vector<1x128x128xbf16>
    %90 = vector.shape_cast %89 : vector<1x128x128xbf16> to vector<128x128xbf16>
    %cst_48 = arith.constant dense<0.000000e+00> : vector<16x128xf32>
    %91 = tpu.matmul %88, %90, %cst_48 {dimension_numbers = #tpu.dot_dimension_numbers<[1], [0], [0], [1], [0, 0, 1, 1], [], []>} : vector<16x128xbf16>, vector<128x128xbf16>, vector<16x128xf32> -> vector<16x128xf32>
    %cst_49 = arith.constant dense<0.000000e+00> : vector<128xf32>
    %92 = vector.multi_reduction <add>, %91, %cst_49 [0] : vector<16x128xf32> to vector<128xf32>
    %93 = vector.shape_cast %92 : vector<128xf32> to vector<1x128xf32>
    %cst_50 = arith.constant 1.600000e+01 : f32
    %94 = vector.broadcast %cst_50 : f32 to vector<1x128xf32>
    %95 = arith.divf %93, %94 : vector<1x128xf32>
    %96 = vector.broadcast %95 : vector<1x128xf32> to vector<16x128xf32>
    %97 = arith.subf %91, %96 : vector<16x128xf32>
    %98 = arith.mulf %97, %97 : vector<16x128xf32>
    %cst_51 = arith.constant dense<0.000000e+00> : vector<128xf32>
    %99 = vector.multi_reduction <add>, %98, %cst_51 [0] : vector<16x128xf32> to vector<128xf32>
    %100 = vector.shape_cast %99 : vector<128xf32> to vector<1x128xf32>
    %cst_52 = arith.constant 1.600000e+01 : f32
    %101 = vector.broadcast %cst_52 : f32 to vector<1x128xf32>
    %102 = arith.divf %100, %101 : vector<1x128xf32>
    %103 = vector.broadcast %95 : vector<1x128xf32> to vector<16x128xf32>
    %104 = arith.subf %91, %103 : vector<16x128xf32>
    %cst_53 = arith.constant 9.99999974E-6 : f32
    %105 = vector.broadcast %cst_53 : f32 to vector<1x128xf32>
    %106 = arith.addf %102, %105 : vector<1x128xf32>
    %107 = math.rsqrt %106 : vector<1x128xf32>
    %108 = vector.broadcast %107 : vector<1x128xf32> to vector<16x128xf32>
    %109 = arith.mulf %104, %108 : vector<16x128xf32>
    %110 = arith.mulf %25, %109 : vector<16x128xf32>
    %cst_54 = arith.constant dense<0xFF800000> : vector<16xf32>
    %111 = vector.multi_reduction <maximumf>, %110, %cst_54 [1] : vector<16x128xf32> to vector<16xf32>
    %112 = vector.shape_cast %111 : vector<16xf32> to vector<16x1xf32>
    %113 = vector.broadcast %112 : vector<16x1xf32> to vector<16x128xf32>
    %114 = arith.subf %110, %113 : vector<16x128xf32>
    %115 = math.exp %114 : vector<16x128xf32>
    %116 = arith.mulf %115, %25 : vector<16x128xf32>
    %cst_55 = arith.constant dense<0.000000e+00> : vector<16xf32>
    %117 = vector.multi_reduction <add>, %116, %cst_55 [1] : vector<16x128xf32> to vector<16xf32>
    %118 = vector.shape_cast %117 : vector<16xf32> to vector<16x1xf32>
    %119 = tpu.reciprocal %118 {approx = true} : vector<16x1xf32> -> vector<16x1xf32>
    %120 = vector.broadcast %119 : vector<16x1xf32> to vector<16x128xf32>
    %121 = arith.mulf %116, %120 : vector<16x128xf32>
    %122 = arith.mulf %121, %18 : vector<16x128xf32>
    %123 = arith.truncf %122 : vector<16x128xf32> to vector<16x128xbf16>
    %c1 = arith.constant 1 : index
    %c0_56 = arith.constant 0 : index
    %c0_57 = arith.constant 0 : index
    %124 = vector.load %arg1[%c1, %c0_56, %c0_57] : memref<3x128x128xbf16, #tpu.memory_space<vmem>>, vector<1x128x128xbf16>
    %125 = vector.shape_cast %124 : vector<1x128x128xbf16> to vector<128x128xbf16>
    %cst_58 = arith.constant dense<0.000000e+00> : vector<16x128xf32>
    %126 = tpu.matmul %123, %125, %cst_58 {dimension_numbers = #tpu.dot_dimension_numbers<[1], [0], [0], [1], [0, 0, 1, 1], [], []>} : vector<16x128xbf16>, vector<128x128xbf16>, vector<16x128xf32> -> vector<16x128xf32>
    %c1_59 = arith.constant 1 : index
    %c0_60 = arith.constant 0 : index
    %c0_61 = arith.constant 0 : index
    %127 = vector.load %arg2[%c1_59, %c0_60, %c0_61] : memref<3x128x128xbf16, #tpu.memory_space<vmem>>, vector<1x128x128xbf16>
    %128 = vector.shape_cast %127 : vector<1x128x128xbf16> to vector<128x128xbf16>
    %cst_62 = arith.constant dense<0.000000e+00> : vector<16x128xf32>
    %129 = tpu.matmul %123, %128, %cst_62 {dimension_numbers = #tpu.dot_dimension_numbers<[1], [0], [0], [1], [0, 0, 1, 1], [], []>} : vector<16x128xbf16>, vector<128x128xbf16>, vector<16x128xf32> -> vector<16x128xf32>
    %130 = arith.negf %129 : vector<16x128xf32>
    %131 = math.exp %130 : vector<16x128xf32>
    %cst_63 = arith.constant 1.000000e+00 : f32
    %132 = vector.broadcast %cst_63 : f32 to vector<16x128xf32>
    %133 = arith.addf %132, %131 : vector<16x128xf32>
    %134 = arith.divf %132, %133 : vector<16x128xf32>
    %135 = arith.mulf %126, %134 : vector<16x128xf32>
    %cst_64 = arith.constant 0.707106769 : f32
    %136 = vector.broadcast %cst_64 : f32 to vector<16x128xf32>
    %137 = arith.mulf %135, %136 : vector<16x128xf32>
    %138 = arith.truncf %135 : vector<16x128xf32> to vector<16x128xbf16>
    %c1_65 = arith.constant 1 : index
    %c0_66 = arith.constant 0 : index
    %c0_67 = arith.constant 0 : index
    %139 = vector.load %arg3[%c1_65, %c0_66, %c0_67] : memref<3x128x128xbf16, #tpu.memory_space<vmem>>, vector<1x128x128xbf16>
    %140 = vector.shape_cast %139 : vector<1x128x128xbf16> to vector<128x128xbf16>
    %cst_68 = arith.constant dense<0.000000e+00> : vector<16x128xf32>
    %141 = tpu.matmul %138, %140, %cst_68 {dimension_numbers = #tpu.dot_dimension_numbers<[1], [0], [0], [1], [0, 0, 1, 1], [], []>} : vector<16x128xbf16>, vector<128x128xbf16>, vector<16x128xf32> -> vector<16x128xf32>
    %c1_69 = arith.constant 1 : index
    %c0_70 = arith.constant 0 : index
    %c0_71 = arith.constant 0 : index
    %142 = vector.load %arg4[%c1_69, %c0_70, %c0_71] : memref<3x128x128xbf16, #tpu.memory_space<vmem>>, vector<1x128x128xbf16>
    %143 = vector.shape_cast %142 : vector<1x128x128xbf16> to vector<128x128xbf16>
    %cst_72 = arith.constant dense<0.000000e+00> : vector<16x128xf32>
    %144 = tpu.matmul %138, %143, %cst_72 {dimension_numbers = #tpu.dot_dimension_numbers<[1], [0], [0], [1], [0, 0, 1, 1], [], []>} : vector<16x128xbf16>, vector<128x128xbf16>, vector<16x128xf32> -> vector<16x128xf32>
    %145 = arith.negf %144 : vector<16x128xf32>
    %146 = math.exp %145 : vector<16x128xf32>
    %cst_73 = arith.constant 1.000000e+00 : f32
    %147 = vector.broadcast %cst_73 : f32 to vector<16x128xf32>
    %148 = arith.addf %147, %146 : vector<16x128xf32>
    %149 = arith.divf %147, %148 : vector<16x128xf32>
    %150 = arith.mulf %141, %149 : vector<16x128xf32>
    %151 = arith.addf %137, %150 : vector<16x128xf32>
    %cst_74 = arith.constant 0.707106769 : f32
    %152 = vector.broadcast %cst_74 : f32 to vector<16x128xf32>
    %153 = arith.mulf %151, %152 : vector<16x128xf32>
    %154 = arith.truncf %151 : vector<16x128xf32> to vector<16x128xbf16>
    %c1_75 = arith.constant 1 : index
    %c0_76 = arith.constant 0 : index
    %c0_77 = arith.constant 0 : index
    %155 = vector.load %arg5[%c1_75, %c0_76, %c0_77] : memref<3x128x128xbf16, #tpu.memory_space<vmem>>, vector<1x128x128xbf16>
    %156 = vector.shape_cast %155 : vector<1x128x128xbf16> to vector<128x128xbf16>
    %cst_78 = arith.constant dense<0.000000e+00> : vector<16x128xf32>
    %157 = tpu.matmul %154, %156, %cst_78 {dimension_numbers = #tpu.dot_dimension_numbers<[1], [0], [0], [1], [0, 0, 1, 1], [], []>} : vector<16x128xbf16>, vector<128x128xbf16>, vector<16x128xf32> -> vector<16x128xf32>
    %c1_79 = arith.constant 1 : index
    %c0_80 = arith.constant 0 : index
    %c0_81 = arith.constant 0 : index
    %158 = vector.load %arg6[%c1_79, %c0_80, %c0_81] : memref<3x128x128xbf16, #tpu.memory_space<vmem>>, vector<1x128x128xbf16>
    %159 = vector.shape_cast %158 : vector<1x128x128xbf16> to vector<128x128xbf16>
    %cst_82 = arith.constant dense<0.000000e+00> : vector<16x128xf32>
    %160 = tpu.matmul %154, %159, %cst_82 {dimension_numbers = #tpu.dot_dimension_numbers<[1], [0], [0], [1], [0, 0, 1, 1], [], []>} : vector<16x128xbf16>, vector<128x128xbf16>, vector<16x128xf32> -> vector<16x128xf32>
    %161 = arith.negf %160 : vector<16x128xf32>
    %162 = math.exp %161 : vector<16x128xf32>
    %cst_83 = arith.constant 1.000000e+00 : f32
    %163 = vector.broadcast %cst_83 : f32 to vector<16x128xf32>
    %164 = arith.addf %163, %162 : vector<16x128xf32>
    %165 = arith.divf %163, %164 : vector<16x128xf32>
    %166 = arith.mulf %157, %165 : vector<16x128xf32>
    %167 = arith.addf %153, %166 : vector<16x128xf32>
    %cst_84 = arith.constant 0.707106769 : f32
    %168 = vector.broadcast %cst_84 : f32 to vector<16x128xf32>
    %169 = arith.mulf %167, %168 : vector<16x128xf32>
    %170 = arith.truncf %167 : vector<16x128xf32> to vector<16x128xbf16>
    %c1_85 = arith.constant 1 : index
    %c0_86 = arith.constant 0 : index
    %c0_87 = arith.constant 0 : index
    %171 = vector.load %arg7[%c1_85, %c0_86, %c0_87] : memref<3x128x128xbf16, #tpu.memory_space<vmem>>, vector<1x128x128xbf16>
    %172 = vector.shape_cast %171 : vector<1x128x128xbf16> to vector<128x128xbf16>
    %cst_88 = arith.constant dense<0.000000e+00> : vector<16x128xf32>
    %173 = tpu.matmul %170, %172, %cst_88 {dimension_numbers = #tpu.dot_dimension_numbers<[1], [0], [0], [1], [0, 0, 1, 1], [], []>} : vector<16x128xbf16>, vector<128x128xbf16>, vector<16x128xf32> -> vector<16x128xf32>
    %c1_89 = arith.constant 1 : index
    %c0_90 = arith.constant 0 : index
    %c0_91 = arith.constant 0 : index
    %174 = vector.load %arg8[%c1_89, %c0_90, %c0_91] : memref<3x128x128xbf16, #tpu.memory_space<vmem>>, vector<1x128x128xbf16>
    %175 = vector.shape_cast %174 : vector<1x128x128xbf16> to vector<128x128xbf16>
    %cst_92 = arith.constant dense<0.000000e+00> : vector<16x128xf32>
    %176 = tpu.matmul %170, %175, %cst_92 {dimension_numbers = #tpu.dot_dimension_numbers<[1], [0], [0], [1], [0, 0, 1, 1], [], []>} : vector<16x128xbf16>, vector<128x128xbf16>, vector<16x128xf32> -> vector<16x128xf32>
    %177 = arith.negf %176 : vector<16x128xf32>
    %178 = math.exp %177 : vector<16x128xf32>
    %cst_93 = arith.constant 1.000000e+00 : f32
    %179 = vector.broadcast %cst_93 : f32 to vector<16x128xf32>
    %180 = arith.addf %179, %178 : vector<16x128xf32>
    %181 = arith.divf %179, %180 : vector<16x128xf32>
    %182 = arith.mulf %173, %181 : vector<16x128xf32>
    %183 = arith.addf %169, %182 : vector<16x128xf32>
    %cst_94 = arith.constant 0.000000e+00 : f32
    %184 = vector.broadcast %cst_94 : f32 to vector<16x128xf32>
    %185 = arith.maximumf %183, %184 : vector<16x128xf32>
    %186 = arith.addf %87, %185 : vector<16x128xf32>
    %cst_95 = arith.constant 1.200000e+00 : f32
    %187 = vector.broadcast %cst_95 : f32 to vector<16x128xf32>
    %188 = arith.subf %187, %121 : vector<16x128xf32>
    %189 = arith.mulf %188, %25 : vector<16x128xf32>
    %190 = arith.truncf %183 : vector<16x128xf32> to vector<16x128xbf16>
    %c1_96 = arith.constant 1 : index
    %c0_97 = arith.constant 0 : index
    %c0_98 = arith.constant 0 : index
    %191 = vector.load %arg9[%c1_96, %c0_97, %c0_98] : memref<2x128x128xbf16, #tpu.memory_space<vmem>>, vector<1x128x128xbf16>
    %192 = vector.shape_cast %191 : vector<1x128x128xbf16> to vector<128x128xbf16>
    %cst_99 = arith.constant dense<0.000000e+00> : vector<16x128xf32>
    %193 = tpu.matmul %190, %192, %cst_99 {dimension_numbers = #tpu.dot_dimension_numbers<[1], [0], [0], [1], [0, 0, 1, 1], [], []>} : vector<16x128xbf16>, vector<128x128xbf16>, vector<16x128xf32> -> vector<16x128xf32>
    %cst_100 = arith.constant dense<0.000000e+00> : vector<128xf32>
    %194 = vector.multi_reduction <add>, %193, %cst_100 [0] : vector<16x128xf32> to vector<128xf32>
    %195 = vector.shape_cast %194 : vector<128xf32> to vector<1x128xf32>
    %cst_101 = arith.constant 1.600000e+01 : f32
    %196 = vector.broadcast %cst_101 : f32 to vector<1x128xf32>
    %197 = arith.divf %195, %196 : vector<1x128xf32>
    %198 = vector.broadcast %197 : vector<1x128xf32> to vector<16x128xf32>
    %199 = arith.subf %193, %198 : vector<16x128xf32>
    %200 = arith.mulf %199, %199 : vector<16x128xf32>
    %cst_102 = arith.constant dense<0.000000e+00> : vector<128xf32>
    %201 = vector.multi_reduction <add>, %200, %cst_102 [0] : vector<16x128xf32> to vector<128xf32>
    %202 = vector.shape_cast %201 : vector<128xf32> to vector<1x128xf32>
    %cst_103 = arith.constant 1.600000e+01 : f32
    %203 = vector.broadcast %cst_103 : f32 to vector<1x128xf32>
    %204 = arith.divf %202, %203 : vector<1x128xf32>
    %205 = vector.broadcast %197 : vector<1x128xf32> to vector<16x128xf32>
    %206 = arith.subf %193, %205 : vector<16x128xf32>
    %cst_104 = arith.constant 9.99999974E-6 : f32
    %207 = vector.broadcast %cst_104 : f32 to vector<1x128xf32>
    %208 = arith.addf %204, %207 : vector<1x128xf32>
    %209 = math.rsqrt %208 : vector<1x128xf32>
    %210 = vector.broadcast %209 : vector<1x128xf32> to vector<16x128xf32>
    %211 = arith.mulf %206, %210 : vector<16x128xf32>
    %212 = arith.mulf %189, %211 : vector<16x128xf32>
    %cst_105 = arith.constant dense<0xFF800000> : vector<16xf32>
    %213 = vector.multi_reduction <maximumf>, %212, %cst_105 [1] : vector<16x128xf32> to vector<16xf32>
    %214 = vector.shape_cast %213 : vector<16xf32> to vector<16x1xf32>
    %215 = vector.broadcast %214 : vector<16x1xf32> to vector<16x128xf32>
    %216 = arith.subf %212, %215 : vector<16x128xf32>
    %217 = math.exp %216 : vector<16x128xf32>
    %218 = arith.mulf %217, %25 : vector<16x128xf32>
    %cst_106 = arith.constant dense<0.000000e+00> : vector<16xf32>
    %219 = vector.multi_reduction <add>, %218, %cst_106 [1] : vector<16x128xf32> to vector<16xf32>
    %220 = vector.shape_cast %219 : vector<16xf32> to vector<16x1xf32>
    %221 = tpu.reciprocal %220 {approx = true} : vector<16x1xf32> -> vector<16x1xf32>
    %222 = vector.broadcast %221 : vector<16x1xf32> to vector<16x128xf32>
    %223 = arith.mulf %218, %222 : vector<16x128xf32>
    %224 = arith.mulf %223, %18 : vector<16x128xf32>
    %225 = arith.truncf %224 : vector<16x128xf32> to vector<16x128xbf16>
    %c2 = arith.constant 2 : index
    %c0_107 = arith.constant 0 : index
    %c0_108 = arith.constant 0 : index
    %226 = vector.load %arg1[%c2, %c0_107, %c0_108] : memref<3x128x128xbf16, #tpu.memory_space<vmem>>, vector<1x128x128xbf16>
    %227 = vector.shape_cast %226 : vector<1x128x128xbf16> to vector<128x128xbf16>
    %cst_109 = arith.constant dense<0.000000e+00> : vector<16x128xf32>
    %228 = tpu.matmul %225, %227, %cst_109 {dimension_numbers = #tpu.dot_dimension_numbers<[1], [0], [0], [1], [0, 0, 1, 1], [], []>} : vector<16x128xbf16>, vector<128x128xbf16>, vector<16x128xf32> -> vector<16x128xf32>
    %c2_110 = arith.constant 2 : index
    %c0_111 = arith.constant 0 : index
    %c0_112 = arith.constant 0 : index
    %229 = vector.load %arg2[%c2_110, %c0_111, %c0_112] : memref<3x128x128xbf16, #tpu.memory_space<vmem>>, vector<1x128x128xbf16>
    %230 = vector.shape_cast %229 : vector<1x128x128xbf16> to vector<128x128xbf16>
    %cst_113 = arith.constant dense<0.000000e+00> : vector<16x128xf32>
    %231 = tpu.matmul %225, %230, %cst_113 {dimension_numbers = #tpu.dot_dimension_numbers<[1], [0], [0], [1], [0, 0, 1, 1], [], []>} : vector<16x128xbf16>, vector<128x128xbf16>, vector<16x128xf32> -> vector<16x128xf32>
    %232 = arith.negf %231 : vector<16x128xf32>
    %233 = math.exp %232 : vector<16x128xf32>
    %cst_114 = arith.constant 1.000000e+00 : f32
    %234 = vector.broadcast %cst_114 : f32 to vector<16x128xf32>
    %235 = arith.addf %234, %233 : vector<16x128xf32>
    %236 = arith.divf %234, %235 : vector<16x128xf32>
    %237 = arith.mulf %228, %236 : vector<16x128xf32>
    %cst_115 = arith.constant 0.707106769 : f32
    %238 = vector.broadcast %cst_115 : f32 to vector<16x128xf32>
    %239 = arith.mulf %237, %238 : vector<16x128xf32>
    %240 = arith.truncf %237 : vector<16x128xf32> to vector<16x128xbf16>
    %c2_116 = arith.constant 2 : index
    %c0_117 = arith.constant 0 : index
    %c0_118 = arith.constant 0 : index
    %241 = vector.load %arg3[%c2_116, %c0_117, %c0_118] : memref<3x128x128xbf16, #tpu.memory_space<vmem>>, vector<1x128x128xbf16>
    %242 = vector.shape_cast %241 : vector<1x128x128xbf16> to vector<128x128xbf16>
    %cst_119 = arith.constant dense<0.000000e+00> : vector<16x128xf32>
    %243 = tpu.matmul %240, %242, %cst_119 {dimension_numbers = #tpu.dot_dimension_numbers<[1], [0], [0], [1], [0, 0, 1, 1], [], []>} : vector<16x128xbf16>, vector<128x128xbf16>, vector<16x128xf32> -> vector<16x128xf32>
    %c2_120 = arith.constant 2 : index
    %c0_121 = arith.constant 0 : index
    %c0_122 = arith.constant 0 : index
    %244 = vector.load %arg4[%c2_120, %c0_121, %c0_122] : memref<3x128x128xbf16, #tpu.memory_space<vmem>>, vector<1x128x128xbf16>
    %245 = vector.shape_cast %244 : vector<1x128x128xbf16> to vector<128x128xbf16>
    %cst_123 = arith.constant dense<0.000000e+00> : vector<16x128xf32>
    %246 = tpu.matmul %240, %245, %cst_123 {dimension_numbers = #tpu.dot_dimension_numbers<[1], [0], [0], [1], [0, 0, 1, 1], [], []>} : vector<16x128xbf16>, vector<128x128xbf16>, vector<16x128xf32> -> vector<16x128xf32>
    %247 = arith.negf %246 : vector<16x128xf32>
    %248 = math.exp %247 : vector<16x128xf32>
    %cst_124 = arith.constant 1.000000e+00 : f32
    %249 = vector.broadcast %cst_124 : f32 to vector<16x128xf32>
    %250 = arith.addf %249, %248 : vector<16x128xf32>
    %251 = arith.divf %249, %250 : vector<16x128xf32>
    %252 = arith.mulf %243, %251 : vector<16x128xf32>
    %253 = arith.addf %239, %252 : vector<16x128xf32>
    %cst_125 = arith.constant 0.707106769 : f32
    %254 = vector.broadcast %cst_125 : f32 to vector<16x128xf32>
    %255 = arith.mulf %253, %254 : vector<16x128xf32>
    %256 = arith.truncf %253 : vector<16x128xf32> to vector<16x128xbf16>
    %c2_126 = arith.constant 2 : index
    %c0_127 = arith.constant 0 : index
    %c0_128 = arith.constant 0 : index
    %257 = vector.load %arg5[%c2_126, %c0_127, %c0_128] : memref<3x128x128xbf16, #tpu.memory_space<vmem>>, vector<1x128x128xbf16>
    %258 = vector.shape_cast %257 : vector<1x128x128xbf16> to vector<128x128xbf16>
    %cst_129 = arith.constant dense<0.000000e+00> : vector<16x128xf32>
    %259 = tpu.matmul %256, %258, %cst_129 {dimension_numbers = #tpu.dot_dimension_numbers<[1], [0], [0], [1], [0, 0, 1, 1], [], []>} : vector<16x128xbf16>, vector<128x128xbf16>, vector<16x128xf32> -> vector<16x128xf32>
    %c2_130 = arith.constant 2 : index
    %c0_131 = arith.constant 0 : index
    %c0_132 = arith.constant 0 : index
    %260 = vector.load %arg6[%c2_130, %c0_131, %c0_132] : memref<3x128x128xbf16, #tpu.memory_space<vmem>>, vector<1x128x128xbf16>
    %261 = vector.shape_cast %260 : vector<1x128x128xbf16> to vector<128x128xbf16>
    %cst_133 = arith.constant dense<0.000000e+00> : vector<16x128xf32>
    %262 = tpu.matmul %256, %261, %cst_133 {dimension_numbers = #tpu.dot_dimension_numbers<[1], [0], [0], [1], [0, 0, 1, 1], [], []>} : vector<16x128xbf16>, vector<128x128xbf16>, vector<16x128xf32> -> vector<16x128xf32>
    %263 = arith.negf %262 : vector<16x128xf32>
    %264 = math.exp %263 : vector<16x128xf32>
    %cst_134 = arith.constant 1.000000e+00 : f32
    %265 = vector.broadcast %cst_134 : f32 to vector<16x128xf32>
    %266 = arith.addf %265, %264 : vector<16x128xf32>
    %267 = arith.divf %265, %266 : vector<16x128xf32>
    %268 = arith.mulf %259, %267 : vector<16x128xf32>
    %269 = arith.addf %255, %268 : vector<16x128xf32>
    %cst_135 = arith.constant 0.707106769 : f32
    %270 = vector.broadcast %cst_135 : f32 to vector<16x128xf32>
    %271 = arith.mulf %269, %270 : vector<16x128xf32>
    %272 = arith.truncf %269 : vector<16x128xf32> to vector<16x128xbf16>
    %c2_136 = arith.constant 2 : index
    %c0_137 = arith.constant 0 : index
    %c0_138 = arith.constant 0 : index
    %273 = vector.load %arg7[%c2_136, %c0_137, %c0_138] : memref<3x128x128xbf16, #tpu.memory_space<vmem>>, vector<1x128x128xbf16>
    %274 = vector.shape_cast %273 : vector<1x128x128xbf16> to vector<128x128xbf16>
    %cst_139 = arith.constant dense<0.000000e+00> : vector<16x128xf32>
    %275 = tpu.matmul %272, %274, %cst_139 {dimension_numbers = #tpu.dot_dimension_numbers<[1], [0], [0], [1], [0, 0, 1, 1], [], []>} : vector<16x128xbf16>, vector<128x128xbf16>, vector<16x128xf32> -> vector<16x128xf32>
    %c2_140 = arith.constant 2 : index
    %c0_141 = arith.constant 0 : index
    %c0_142 = arith.constant 0 : index
    %276 = vector.load %arg8[%c2_140, %c0_141, %c0_142] : memref<3x128x128xbf16, #tpu.memory_space<vmem>>, vector<1x128x128xbf16>
    %277 = vector.shape_cast %276 : vector<1x128x128xbf16> to vector<128x128xbf16>
    %cst_143 = arith.constant dense<0.000000e+00> : vector<16x128xf32>
    %278 = tpu.matmul %272, %277, %cst_143 {dimension_numbers = #tpu.dot_dimension_numbers<[1], [0], [0], [1], [0, 0, 1, 1], [], []>} : vector<16x128xbf16>, vector<128x128xbf16>, vector<16x128xf32> -> vector<16x128xf32>
    %279 = arith.negf %278 : vector<16x128xf32>
    %280 = math.exp %279 : vector<16x128xf32>
    %cst_144 = arith.constant 1.000000e+00 : f32
    %281 = vector.broadcast %cst_144 : f32 to vector<16x128xf32>
    %282 = arith.addf %281, %280 : vector<16x128xf32>
    %283 = arith.divf %281, %282 : vector<16x128xf32>
    %284 = arith.mulf %275, %283 : vector<16x128xf32>
    %285 = arith.addf %271, %284 : vector<16x128xf32>
    %cst_145 = arith.constant 0.000000e+00 : f32
    %286 = vector.broadcast %cst_145 : f32 to vector<16x128xf32>
    %287 = arith.maximumf %285, %286 : vector<16x128xf32>
    %288 = arith.addf %186, %287 : vector<16x128xf32>
    %289 = arith.truncf %288 : vector<16x128xf32> to vector<16x128xbf16>
    %c0_146 = arith.constant 0 : index
    %c0_147 = arith.constant 0 : index
    %290 = vector.load %arg10[%c0_146, %c0_147] : memref<128x128xbf16, #tpu.memory_space<vmem>>, vector<128x128xbf16>
    %cst_148 = arith.constant dense<0.000000e+00> : vector<16x128xf32>
    %291 = tpu.matmul %289, %290, %cst_148 {dimension_numbers = #tpu.dot_dimension_numbers<[1], [0], [0], [1], [0, 0, 1, 1], [], []>} : vector<16x128xbf16>, vector<128x128xbf16>, vector<16x128xf32> -> vector<16x128xf32>
    %c0_149 = arith.constant 0 : index
    %c0_150 = arith.constant 0 : index
    %292 = vector.load %arg11[%c0_149, %c0_150] : memref<1x128xf32, #tpu.memory_space<vmem>>, vector<1x128xf32>
    %293 = vector.broadcast %292 : vector<1x128xf32> to vector<16x128xf32>
    %294 = arith.addf %291, %293 : vector<16x128xf32>
    %c0_151 = arith.constant 0 : index
    %c0_152 = arith.constant 0 : index
    %295 = vector.load %arg12[%c0_151, %c0_152] : memref<16x128xf32, #tpu.memory_space<vmem>>, vector<16x128xf32>
    tpu.vector_store %arg12[%c0_151, %c0_152], %294 {strides = array<i32>} : memref<16x128xf32, #tpu.memory_space<vmem>>, vector<16x128xf32>,
    return
  }
}

</mosaic_0001>

<bundles_post_ra>
// kernel: tpu_custom_call.1
= control target key start
LH: loop header
LB: loop body
LE: loop exit
PB: predicated region body
PF: predicated region fallthrough
CT: control target
= control target key end

     0   :  { %17 = vsyncpa [#allocation3], 0  ;;  %s4886_s0 = inlined_call_operand.hbm [shape: f32[16,128], index: 0, kind: input, shape index: {}]   ;;  %s4887_s1 = inlined_call_operand.hbm [shape: bf16[3,128,128], index: 1, kind: input, shape index: {}]   ;;  %s4888_s2 = inlined_call_operand.hbm [shape: bf16[3,128,128], index: 2, kind: input, shape index: {}]   ;;  %s4889_s3 = inlined_call_operand.hbm [shape: bf16[3,128,128], index: 3, kind: input, shape index: {}]   ;;  %s4890_s4 = inlined_call_operand.hbm [shape: bf16[3,128,128], index: 4, kind: input, shape index: {}]   ;;  %s4891_s5 = inlined_call_operand.hbm [shape: bf16[3,128,128], index: 5, kind: input, shape index: {}]   ;;  %s4892_s6 = inlined_call_operand.hbm [shape: bf16[3,128,128], index: 6, kind: input, shape index: {}]   ;;  %s4893_s7 = inlined_call_operand.hbm [shape: bf16[3,128,128], index: 7, kind: input, shape index: {}]   ;;  %s4894_s8 = inlined_call_operand.hbm [shape: bf16[3,128,128], index: 8, kind: input, shape index: {}]   ;;  %s4895_s9 = inlined_call_operand.hbm [shape: bf16[2,128,128], index: 9, kind: input, shape index: {}]   ;;  %s4896_s10 = inlined_call_operand.hbm [shape: bf16[128,128], index: 10, kind: input, shape index: {}]   ;;  %s4897_s11 = inlined_call_operand.vmem [shape: f32[1,128], index: 11, kind: input, shape index: {}]   ;;  %s4898_s12 = inlined_call_operand.hbm [shape: f32[16,128], index: 12, kind: output, shape index: {}]  }
   0x1   :  { %18 = vsyncpa [#allocation6], 0 }
   0x2   :  { %19 = vsyncpa [#allocation9], 0 }
   0x3   :  { %20 = vsyncpa [#allocation12], 0 }
   0x4   :  { %21 = vsyncpa [#allocation15], 0 }
   0x5   :  { %22 = vsyncpa [#allocation18], 0  ;;  %s41_s23 = sshll.u32 %s4887_s1, 4  ;;  %s42_s23 = int_to_ptr.hbm [resolvable:$true] %s41_s23 }
   0x6   :  { %23 = vsyncpa [#allocation4], 0  ;;  %s4616_s24 = smov [#allocation5]   ;;  %s67_s28 = sshll.u32 %s4889_s3, 4  ;;  %s68_s28 = int_to_ptr.hbm [resolvable:$true] %s67_s28 }
   0x7   :  { %s43_s25 = sshll.u32 %s4616_s24, 4  ;;  %s4617_s29 = smov 64   ;;  %s44_s25 = int_to_ptr.vmem [resolvable:$true] %s43_s25 }
   0x8   :  { %s4618_s30 = smov 4   ;;  %s4619_s13 = smov [#allocation8]  }
   0x9   :  { %49 = dma.hbm_to_vmem [thread:$0]  %s42_s23, 3072, %s44_s25, [#allocation6], %s4617_s29, %s4617_s29, %s4618_s30  }
   0xa   :  { %s69_s14 = sshll.u32 %s4619_s13, 4  ;;  %s93_s16 = sshll.u32 %s4891_s5, 4  ;;  %s70_s14 = int_to_ptr.vmem [resolvable:$true] %s69_s14  ;;  %s94_s16 = int_to_ptr.hbm [resolvable:$true] %s93_s16 }
   0xb   :  { %75 = dma.hbm_to_vmem [thread:$0]  %s68_s28, 3072, %s70_s14, [#allocation9], %s4617_s29, %s4617_s29, %s4618_s30  }
   0xc   :  { %s119_s18 = sshll.u32 %s4893_s7, 4  ;;  %s4620_s19 = smov [#allocation11]   ;;  %s120_s18 = int_to_ptr.hbm [resolvable:$true] %s119_s18 }
   0xd   :  { %s95_s20 = sshll.u32 %s4620_s19, 4  ;;  %s4621_s21 = smov [#allocation14]   ;;  %s96_s20 = int_to_ptr.vmem [resolvable:$true] %s95_s20 }
   0xe   :  { %101 = dma.hbm_to_vmem [thread:$0]  %s94_s16, 3072, %s96_s20, [#allocation12], %s4617_s29, %s4617_s29, %s4618_s30  }
   0xf   :  { %s121_s5 = sshll.u32 %s4621_s21, 4  ;;  %s145_s24 = sshll.u32 %s4895_s9, 4  ;;  %s122_s5 = int_to_ptr.vmem [resolvable:$true] %s121_s5  ;;  %s146_s24 = int_to_ptr.hbm [resolvable:$true] %s145_s24 }
  0x10   :  { %127 = dma.hbm_to_vmem [thread:$0]  %s120_s18, 3072, %s122_s5, [#allocation15], %s4617_s29, %s4617_s29, %s4618_s30  }
  0x11   :  { %s28_s26 = sshll.u32 %s4886_s0, 4  ;;  %s4622_s27 = smov [#allocation17]   ;;  %s29_s26 = int_to_ptr.hbm [resolvable:$true] %s28_s26 }
  0x12   :  { %s147_s28 = sshll.u32 %s4622_s27, 4  ;;  %s4623_s13 = smov [#allocation2]   ;;  %s148_s28 = int_to_ptr.vmem [resolvable:$true] %s147_s28 }
  0x13   :  { %153 = dma.hbm_to_vmem [thread:$0]  %s146_s24, 2048, %s148_s28, [#allocation18], %s4617_s29, %s4617_s29, %s4618_s30  }
  0x14   :  { %s30_s9 = sshll.u32 %s4623_s13, 4  ;;  %s4624_s14 = smov 128   ;;  %s31_s9 = int_to_ptr.vmem [resolvable:$true] %s30_s9 }
  0x15   :  { %s4625_s15 = smov 8   ;;  %s54_s0 = sshll.u32 %s4888_s2, 4  ;;  %s55_s0 = int_to_ptr.hbm [resolvable:$true] %s54_s0 }
  0x16   :  { %36 = dma.hbm_to_vmem [thread:$0]  %s29_s26, 256, %s31_s9, [#allocation3], %s4624_s14, %s4624_s14, %s4625_s15  }
  0x17   :  { %s4626_s3 = smov [#allocation7]   ;;  %s80_s20 = sshll.u32 %s4890_s4, 4  ;;  %s81_s20 = int_to_ptr.hbm [resolvable:$true] %s80_s20 }
  0x18   :  { %s56_s17 = sshll.u32 %s4626_s3, 4  ;;  %s4627_s21 = smov [#allocation10]   ;;  %s57_s17 = int_to_ptr.vmem [resolvable:$true] %s56_s17 }
  0x19   :  { %62 = dma.hbm_to_vmem [thread:$0]  %s55_s0, 3072, %s57_s17, [#allocation6], %s4617_s29, %s4617_s29, %s4618_s30  }
  0x1a   :  { %s82_s5 = sshll.u32 %s4627_s21, 4  ;;  %s106_s24 = sshll.u32 %s4892_s6, 4  ;;  %s83_s5 = int_to_ptr.vmem [resolvable:$true] %s82_s5  ;;  %s107_s24 = int_to_ptr.hbm [resolvable:$true] %s106_s24 }
  0x1b   :  { %88 = dma.hbm_to_vmem [thread:$0]  %s81_s20, 3072, %s83_s5, [#allocation9], %s4617_s29, %s4617_s29, %s4618_s30  }
  0x1c   :  { %s132_s4 = sshll.u32 %s4894_s8, 4  ;;  %s4628_s25 = smov [#allocation13]   ;;  %s133_s4 = int_to_ptr.hbm [resolvable:$true] %s132_s4 }
  0x1d   :  { %s108_s26 = sshll.u32 %s4628_s25, 4  ;;  %s4629_s27 = smov [#allocation16]   ;;  %s109_s26 = int_to_ptr.vmem [resolvable:$true] %s108_s26 }
  0x1e   :  { %114 = dma.hbm_to_vmem [thread:$0]  %s107_s24, 3072, %s109_s26, [#allocation12], %s4617_s29, %s4617_s29, %s4618_s30  }
  0x1f   :  { %s134_s6 = sshll.u32 %s4629_s27, 4  ;;  %s158_s9 = sshll.u32 %s4896_s10, 4  ;;  %s135_s6 = int_to_ptr.vmem [resolvable:$true] %s134_s6  ;;  %s159_s9 = int_to_ptr.hbm [resolvable:$true] %s158_s9 }
  0x20   :  { %140 = dma.hbm_to_vmem [thread:$0]  %s133_s4, 3072, %s135_s6, [#allocation15], %s4617_s29, %s4617_s29, %s4618_s30  }
  0x21   :  { %s4630_s8 = smov [#allocation19]  }
  0x22   :  { %s160_s1 = sshll.u32 %s4630_s8, 4  ;;  %s161_s1 = int_to_ptr.vmem [resolvable:$true] %s160_s1 }
  0x23   :  { %166 = dma.hbm_to_vmem [thread:$0]  %s159_s9, 1024, %s161_s1, [#allocation18], %s4617_s29, %s4617_s29, %s4618_s30  }
  0x24   :  { %4602 = dma.done.wait [#allocation3], 256  }
  0x25   :  { %4603 = vsyncadd [#allocation3], 4294967040 }
  0x26   :  { %4604 = dma.done.wait [#allocation6], 6144  }
  0x27   :  { %4605 = vsyncadd [#allocation6], 4294961152 }
  0x28   :  { %4606 = dma.done.wait [#allocation9], 6144  }
  0x29   :  { %4607 = vsyncadd [#allocation9], 4294961152 }
  0x2a   :  { %4608 = dma.done.wait [#allocation12], 6144  }
  0x2b   :  { %4609 = vsyncadd [#allocation12], 4294961152 }
  0x2c   :  { %4610 = dma.done.wait [#allocation15], 6144  }
  0x2d   :  { %4611 = vsyncadd [#allocation15], 4294961152 }
  0x2e   :  { %4612 = dma.done.wait [#allocation18], 3072  }
  0x2f   :  { %4613 = vsyncadd [#allocation18], 4294964224  ;;  %v4631_v0 = vmov 16.0   ;;  %v3974_v2 = vld [vmem:[#allocation7 + $0x38] sm:$0xff]  ;;  %v3973_v5 = vld [vmem:[#allocation7 + $0x30] sm:$0xff]  ;;  %s4633_s30 = smov [#allocation20]  }
  0x30   :  { %4194 = vrcp.f32 %v4631_v0  ;;  %v3966_v3 = vld [vmem:[#allocation5 + $0x38] sm:$0xff]  ;;  %403 = vmatpush.bf16.msra.mxu1 %v3974_v2  ;;  %v3965_v6 = vld [vmem:[#allocation5 + $0x30] sm:$0xff]  ;;  %v3972_v11 = vld [vmem:[#allocation7 + $0x28] sm:$0xff]  ;;  %s3050_s16 = sshll.u32 %s4633_s30, 4  ;;  %s3052_s17 = sshll.u32 %s4898_s12, 4  ;;  %s3051_s16 = int_to_ptr.vmem [resolvable:$true] %s3050_s16  ;;  %s3053_s17 = int_to_ptr.hbm [resolvable:$true] %s3052_s17 }
  0x31   :  { %325 = vmatpush.bf16.msra.mxu0 %v3966_v3  ;;  %v213_v7 = vld [vmem:[#allocation2] sm:$0xff]  ;;  %v214_v8 = vld [vmem:[#allocation2 + $0x8] sm:$0xff]  ;;  %v3964_v12 = vld [vmem:[#allocation5 + $0x28] sm:$0xff] }
  0x32   :  { %v215_v10 = vadd.f32 %v214_v8, %v213_v7  ;;  %v3971_v16 = vld [vmem:[#allocation7 + $0x20] sm:$0xff]  ;;  %v3970_v20 = vld [vmem:[#allocation7 + $0x18] sm:$0xff]  ;;  %v3969_v24 = vld [vmem:[#allocation7 + $0x10] sm:$0xff] }
  0x33   :  { %v3968_v28 = vld [vmem:[#allocation7 + $0x8] sm:$0xff]  ;;  %v3967_v32 = vld [vmem:[#allocation7] sm:$0xff]  ;;  %v3962_v38 = vld [vmem:[#allocation5 + $0x18] sm:$0xff] }
  0x34   :  { %404 = vmatpush.bf16.msra.mxu1 %v3973_v5  ;;  %v216_v13 = vrot.slane %v215_v10, 4  ;;  %v3963_v36 = vld [vmem:[#allocation5 + $0x20] sm:$0xff]  ;;  %v3961_v41 = vld [vmem:[#allocation5 + $0x10] sm:$0xff]  ;;  %v3960_v44 = vld [vmem:[#allocation5 + $0x8] sm:$0xff] }
  0x35   :  { %326 = vmatpush.bf16.msra.mxu0 %v3965_v6  ;;  %v3959_v45 = vld [vmem:[#allocation5] sm:$0xff]  ;;  %v3982_v56 = vld [vmem:[#allocation8 + $0x38] sm:$0xff]  ;;  %v3981_v58 = vld [vmem:[#allocation8 + $0x30] sm:$0xff] }
  0x36   :  { %v4195_v1 = vpop.eup %4194  ;;  %v217_v15 = vadd.f32 %v216_v13, %v215_v10  ;;  %v3990_v57 = vld [vmem:[#allocation10 + $0x38] sm:$0xff]  ;;  %524 = vmatpush.bf16.msra.mxu2 %v3982_v56  ;;  %v3989_v59 = vld [vmem:[#allocation10 + $0x30] sm:$0xff]  ;;  %v3980_v60 = vld [vmem:[#allocation8 + $0x28] sm:$0xff] }
  0x37   :  { %v223_v4 = vmul.f32 16.0, %v4195_v1  ;;  %vm227_vm0 = vweird.f32 %v4195_v1  ;;  %602 = vmatpush.bf16.msra.mxu3 %v3990_v57  ;;  %v3988_v61 = vld [vmem:[#allocation10 + $0x28] sm:$0xff]  ;;  %v3979_v62 = vld [vmem:[#allocation8 + $0x20] sm:$0xff]  ;;  %v3978_v0 = vld [vmem:[#allocation8 + $0x18] sm:$0xff] }
  0x38   :  { %405 = vmatpush.bf16.msra.mxu1 %v3972_v11  ;;  %v218_v17 = vrot.slane %v217_v15, 2  ;;  %v3987_v63 = vld [vmem:[#allocation10 + $0x20] sm:$0xff]  ;;  %v3977_v2 = vld [vmem:[#allocation8 + $0x10] sm:$0xff]  ;;  %v3976_v5 = vld [vmem:[#allocation8 + $0x8] sm:$0xff] }
  0x39   :  { %v224_v9 = vsub.f32 1.0, %v223_v4  ;;  %327 = vmatpush.bf16.msra.mxu0 %v3964_v12  ;;  %v3985_v3 = vld [vmem:[#allocation10 + $0x10] sm:$0xff]  ;;  %v3984_v6 = vld [vmem:[#allocation10 + $0x8] sm:$0xff] }
  0x3a   :  { %v219_v19 = vadd.f32 %v218_v17, %v217_v15  ;;  %525 = vmatpush.bf16.msra.mxu2 %v3981_v58  ;;  %v3992_v57 = vld [vmem:[#allocation11 + $0x8] sm:$0xff] }
  0x3b   :  { %v225_v14 = vmul.f32 %v4195_v1, %v224_v9  ;;  %603 = vmatpush.bf16.msra.mxu3 %v3989_v59  ;;  %v3983_v9 = vld [vmem:[#allocation10] sm:$0xff]  ;;  %v4000_v58 = vld [vmem:[#allocation13 + $0x8] sm:$0xff] }
  0x3c   :  { %406 = vmatpush.bf16.msra.mxu1 %v3971_v16  ;;  %v220_v21 = vrot.slane %v219_v19, 1 }
  0x3d   :  { %v226_v18 = vadd.f32 %v4195_v1, %v225_v14  ;;  %328 = vmatpush.bf16.msra.mxu0 %v3963_v36 }
  0x3e   :  { %v221_v23 = vadd.f32 %v220_v21, %v219_v19  ;;  %526 = vmatpush.bf16.msra.mxu2 %v3980_v60  ;;  %v3991_v60 = vld [vmem:[#allocation11] sm:$0xff] }
  0x3f   :  { %v4765_v22 = vsel %vm227_vm0, %v4195_v1, %v226_v18  ;;  %604 = vmatpush.bf16.msra.mxu3 %v3988_v61  ;;  %v3986_v1 = vld [vmem:[#allocation10 + $0x18] sm:$0xff]  ;;  %v3999_v61 = vld [vmem:[#allocation13] sm:$0xff] }
  0x40   :  { %407 = vmatpush.bf16.msra.mxu1 %v3970_v20  ;;  %v229_v25 = vmul.f32 %v4765_v22, %v221_v23 }
  0x41   :  { %329 = vmatpush.bf16.msra.mxu0 %v3962_v38 }
  0x42   :  { %v230_v26 = vsub.f32 %v213_v7, %v229_v25  ;;  %v231_v27 = vsub.f32 %v214_v8, %v229_v25  ;;  %527 = vmatpush.bf16.msra.mxu2 %v3979_v62  ;;  %v3975_v8 = vld [vmem:[#allocation8] sm:$0xff] }
  0x43   :  { %605 = vmatpush.bf16.msra.mxu3 %v3987_v63 }
  0x44   :  { %408 = vmatpush.bf16.msra.mxu1 %v3969_v24  ;;  %v232_v29 = vmul.f32 %v230_v26, %v230_v26  ;;  %v233_v30 = vmul.f32 %v231_v27, %v231_v27 }
  0x45   :  { %330 = vmatpush.bf16.msra.mxu0 %v3961_v41 }
  0x46   :  { %v234_v31 = vadd.f32 %v233_v30, %v232_v29  ;;  %528 = vmatpush.bf16.msra.mxu2 %v3978_v0 }
  0x47   :  { %606 = vmatpush.bf16.msra.mxu3 %v3986_v1 }
  0x48   :  { %409 = vmatpush.bf16.msra.mxu1 %v3968_v28  ;;  %v235_v33 = vrot.slane %v234_v31, 4 }
  0x49   :  { %331 = vmatpush.bf16.msra.mxu0 %v3960_v44  ;;  %v3997_v44 = vld [vmem:[#allocation11 + $0x30] sm:$0xff] }
  0x4a   :  { %v236_v34 = vadd.f32 %v235_v33, %v234_v31  ;;  %529 = vmatpush.bf16.msra.mxu2 %v3977_v2 }
  0x4b   :  { %607 = vmatpush.bf16.msra.mxu3 %v3985_v3 }
  0x4c   :  { %410 = vmatpush.bf16.msra.mxu1 %v3967_v32  ;;  %v237_v35 = vrot.slane %v236_v34, 2 }
  0x4d   :  { %332 = vmatpush.bf16.msra.mxu0 %v3959_v45  ;;  %v4005_v45 = vld [vmem:[#allocation13 + $0x30] sm:$0xff] }
  0x4e   :  { %v238_v37 = vadd.f32 %v237_v35, %v236_v34  ;;  %530 = vmatpush.bf16.msra.mxu2 %v3976_v5 }
  0x4f   :  { %608 = vmatpush.bf16.msra.mxu3 %v3984_v6 }
  0x50   :  { %v239_v39 = vrot.slane %v238_v37, 1 }
  0x52   :  { %v240_v40 = vadd.f32 %v239_v39, %v238_v37  ;;  %531 = vmatpush.bf16.msra.mxu2 %v3975_v8 }
  0x53   :  { %609 = vmatpush.bf16.msra.mxu3 %v3983_v9 }
  0x54   :  { %v241_v42 = vmul.f32 %v240_v40, %v4765_v22 }
  0x56   :  { %v242_v43 = vadd.f32 1e-05, %v241_v42  ;;  %v3998_v42 = vld [vmem:[#allocation11 + $0x38] sm:$0xff] }
  0x57   :  { %725 = vmatpush.bf16.msrb.mxu0 %v3998_v42  ;;  %v4010_v42 = vld [vmem:[#allocation14 + $0x18] sm:$0xff] }
  0x58   :  { %4196 = vrsqrt.f32 %v242_v43  ;;  %vm249_vm1 = vweird.f32 %v242_v43 }
  0x5b   :  { %726 = vmatpush.bf16.msrb.mxu0 %v3997_v44  ;;  %v4009_v44 = vld [vmem:[#allocation14 + $0x10] sm:$0xff] }
  0x5e   :  { %v4197_v46 = vpop.eup %4196 }
  0x5f   :  { %v244_v47 = vmul.f32 %v4197_v46, %v242_v43  ;;  %vm250_vm2 = vweird.f32 %v4197_v46  ;;  %v4006_v43 = vld [vmem:[#allocation13 + $0x38] sm:$0xff] }
  0x60   :  { %vm251_vm3 = vmor %vm249_vm1, %vm250_vm2  ;;  %803 = vmatpush.bf16.msrb.mxu1 %v4006_v43  ;;  %v4018_v43 = vld [vmem:[#allocation16 + $0x18] sm:$0xff] }
  0x61   :  { %v245_v48 = vmul.f32 %v4197_v46, %v244_v47  ;;  %v4004_v47 = vld [vmem:[#allocation13 + $0x28] sm:$0xff] }
  0x63   :  { %v246_v49 = vmul.f32 0.5, %v245_v48  ;;  %v3995_v48 = vld [vmem:[#allocation11 + $0x20] sm:$0xff] }
  0x64   :  { %804 = vmatpush.bf16.msrb.mxu1 %v4005_v45  ;;  %v4017_v45 = vld [vmem:[#allocation16 + $0x10] sm:$0xff] }
  0x65   :  { %v247_v50 = vsub.f32 1.5, %v246_v49  ;;  %v4003_v49 = vld [vmem:[#allocation13 + $0x20] sm:$0xff] }
  0x67   :  { %v248_v51 = vmul.f32 %v4197_v46, %v247_v50  ;;  %v3994_v50 = vld [vmem:[#allocation11 + $0x18] sm:$0xff] }
  0x68   :  { %805 = vmatpush.bf16.msrb.mxu1 %v4004_v47  ;;  %v4008_v47 = vld [vmem:[#allocation14 + $0x8] sm:$0xff] }
  0x69   :  { %v252_v52 = vsel %vm251_vm3, %v4197_v46, %v248_v51  ;;  %v3996_v46 = vld [vmem:[#allocation11 + $0x28] sm:$0xff]  ;;  %v4002_v51 = vld [vmem:[#allocation13 + $0x18] sm:$0xff] }
  0x6a   :  { %v4769_v53 = vmul.f32 %v252_v52, %v230_v26  ;;  %v4771_v54 = vmul.f32 %v252_v52, %v231_v27  ;;  %727 = vmatpush.bf16.msrb.mxu0 %v3996_v46  ;;  %v3993_v52 = vld [vmem:[#allocation11 + $0x10] sm:$0xff] }
  0x6c   :  { %v260_v55 = vpack.c.bf16 %v4771_v54, %v4769_v53  ;;  %806 = vmatpush.bf16.msrb.mxu1 %v4003_v49 }
  0x6e   :  { %411 = vmatmul.bf16.vlgmr.msra.gmra.mxu1 %v260_v55  ;;  %333 = vmatmul.bf16.vlgmr.msra.gmra.mxu0 %v260_v55  ;;  %v4001_v55 = vld [vmem:[#allocation13 + $0x10] sm:$0xff] }
  0x6f   :  { %728 = vmatpush.bf16.msrb.mxu0 %v3995_v48  ;;  %v4016_v48 = vld [vmem:[#allocation16 + $0x8] sm:$0xff] }
  0x70   :  { %807 = vmatpush.bf16.msrb.mxu1 %v4002_v51  ;;  %v4015_v51 = vld [vmem:[#allocation16] sm:$0xff] }
  0x73   :  { %729 = vmatpush.bf16.msrb.mxu0 %v3994_v50  ;;  %v4007_v50 = vld [vmem:[#allocation14] sm:$0xff] }
  0x74   :  { %808 = vmatpush.bf16.msrb.mxu1 %v4001_v55 }
  0x77   :  { %730 = vmatpush.bf16.msrb.mxu0 %v3993_v52 }
  0x78   :  { %809 = vmatpush.bf16.msrb.mxu1 %v4000_v58 }
  0x7b   :  { %731 = vmatpush.bf16.msrb.mxu0 %v3992_v57 }
  0x7c   :  { %810 = vmatpush.bf16.msrb.mxu1 %v3999_v61 }
  0x7f   :  { %732 = vmatpush.bf16.msrb.mxu0 %v3991_v60 }
  0xeb   :  { %v412_v4 = vpop.f32.mrf.mxu1  ;;  %v334_v21 = vpop.f32.mrf.mxu0 }
  0xec   :  { %v3135_v7 = vmul.f32 -1.442695, %v412_v4 }
  0xee   :  { %4198 = vpow2.f32 %v3135_v7 }
  0xf3   :  { %v414_v10 = vpop.f32.mrf.mxu1  ;;  %v336_v37 = vpop.f32.mrf.mxu0 }
  0xf4   :  { %v4199_v11 = vpop.eup %4198  ;;  %v3136_v12 = vmul.f32 -1.442695, %v414_v10 }
  0xf5   :  { %v423_v13 = vadd.f32 1.0, %v4199_v11 }
  0xf6   :  { %4200 = vpow2.f32 %v3136_v12 }
  0xf7   :  { %4202 = vrcp.f32 %v423_v13  ;;  %v436_v25 = vand.u32 2147483648, %v423_v13  ;;  %vm430_vm5 = vweird.f32 %v423_v13  ;;  %v434_v26 = vand.u32 2147483647, %v423_v13 }
  0xf9   :  { %v437_v32 = vor.u32 1.1754944e-38, %v436_v25  ;;  %vm435_vm8 = vcmp.eq.f32.partialorder %v434_v26, 8.507059e+37 }
  0xfc   :  { %v4201_v14 = vpop.eup %4200 }
  0xfd   :  { %v4203_v15 = vpop.eup %4202  ;;  %v424_v16 = vadd.f32 1.0, %v4201_v14 }
  0xfe   :  { %v426_v17 = vmul.f32 %v4203_v15, %v423_v13  ;;  %vm431_vm4 = vweird.f32 %v4203_v15 }
  0xff   :  { %4204 = vrcp.f32 %v424_v16  ;;  %vm432_vm6 = vmor %vm430_vm5, %vm431_vm4  ;;  %v451_v28 = vand.u32 2147483648, %v424_v16  ;;  %v449_v31 = vand.u32 2147483647, %v424_v16  ;;  %vm445_vm9 = vweird.f32 %v424_v16 }
 0x100   :  { %v427_v18 = vsub.f32 1.0, %v426_v17 }
 0x101   :  { %v452_v35 = vor.u32 1.1754944e-38, %v451_v28  ;;  %vm450_vm11 = vcmp.eq.f32.partialorder %v449_v31, 8.507059e+37 }
 0x102   :  { %v428_v19 = vmul.f32 %v4203_v15, %v427_v18 }
 0x104   :  { %v429_v23 = vadd.f32 %v4203_v15, %v428_v19 }
 0x105   :  { %v4205_v20 = vpop.eup %4204 }
 0x106   :  { %v441_v24 = vmul.f32 %v4205_v20, %v424_v16  ;;  %v433_v29 = vsel %vm432_vm6, %v4203_v15, %v429_v23  ;;  %vm446_vm7 = vweird.f32 %v4205_v20 }
 0x107   :  { %v438_v34 = vsel %vm435_vm8, %v437_v32, %v433_v29  ;;  %vm447_vm10 = vmor %vm445_vm9, %vm446_vm7 }
 0x108   :  { %v442_v27 = vsub.f32 1.0, %v441_v24  ;;  %v4775_v39 = vmul.f32 %v438_v34, %v334_v21  ;;  %v4014_v34 = vld [vmem:[#allocation14 + $0x38] sm:$0xff] }
 0x109   :  { %926 = vmatpush.bf16.msrb.mxu2 %v4014_v34 }
 0x10a   :  { %v443_v30 = vmul.f32 %v4205_v20, %v442_v27  ;;  %v457_v28 = vmul.f32 0.70710677, %v4775_v39 }
 0x10c   :  { %v444_v33 = vadd.f32 %v4205_v20, %v443_v30 }
 0x10e   :  { %v448_v36 = vsel %vm447_vm10, %v4205_v20, %v444_v33 }
 0x10f   :  { %v453_v38 = vsel %vm450_vm11, %v452_v35, %v448_v36  ;;  %v4022_v35 = vld [vmem:[#allocation16 + $0x38] sm:$0xff]  ;;  %v4013_v36 = vld [vmem:[#allocation14 + $0x30] sm:$0xff] }
 0x110   :  { %v4777_v40 = vmul.f32 %v453_v38, %v336_v37  ;;  %1004 = vmatpush.bf16.msrb.mxu3 %v4022_v35  ;;  %v4021_v37 = vld [vmem:[#allocation16 + $0x30] sm:$0xff]  ;;  %927 = vmatpush.bf16.msrb.mxu2 %v4013_v36  ;;  %v4012_v38 = vld [vmem:[#allocation14 + $0x28] sm:$0xff]  ;;  %v4023_v35 = vld [vmem:[#allocation17] sm:$0xff] }
 0x112   :  { %v459_v41 = vpack.c.bf16 %v4777_v40, %v4775_v39  ;;  %v458_v29 = vmul.f32 0.70710677, %v4777_v40  ;;  %v4020_v39 = vld [vmem:[#allocation16 + $0x28] sm:$0xff]  ;;  %v4011_v40 = vld [vmem:[#allocation14 + $0x20] sm:$0xff] }
 0x114   :  { %532 = vmatmul.bf16.vlgmr.msra.gmra.mxu2 %v459_v41  ;;  %610 = vmatmul.bf16.vlgmr.msra.gmra.mxu3 %v459_v41  ;;  %v4019_v41 = vld [vmem:[#allocation16 + $0x20] sm:$0xff] }
 0x115   :  { %1005 = vmatpush.bf16.msrb.mxu3 %v4021_v37  ;;  %928 = vmatpush.bf16.msrb.mxu2 %v4012_v38 }
 0x119   :  { %1006 = vmatpush.bf16.msrb.mxu3 %v4020_v39  ;;  %929 = vmatpush.bf16.msrb.mxu2 %v4011_v40 }
 0x11d   :  { %1007 = vmatpush.bf16.msrb.mxu3 %v4019_v41  ;;  %930 = vmatpush.bf16.msrb.mxu2 %v4010_v42 }
 0x121   :  { %1008 = vmatpush.bf16.msrb.mxu3 %v4018_v43  ;;  %931 = vmatpush.bf16.msrb.mxu2 %v4009_v44 }
 0x125   :  { %1009 = vmatpush.bf16.msrb.mxu3 %v4017_v45  ;;  %932 = vmatpush.bf16.msrb.mxu2 %v4008_v47 }
 0x129   :  { %1010 = vmatpush.bf16.msrb.mxu3 %v4016_v48  ;;  %933 = vmatpush.bf16.msrb.mxu2 %v4007_v50 }
 0x12d   :  { %1011 = vmatpush.bf16.msrb.mxu3 %v4015_v51 }
 0x197   :  { %v611_v56 = vpop.f32.mrf.mxu3  ;;  %v533_v10 = vpop.f32.mrf.mxu2 }
 0x198   :  { %v3201_v59 = vmul.f32 -1.442695, %v611_v56 }
 0x19a   :  { %4206 = vpow2.f32 %v3201_v59 }
 0x19f   :  { %v613_v62 = vpop.f32.mrf.mxu3  ;;  %v535_v26 = vpop.f32.mrf.mxu2 }
 0x1a0   :  { %v4207_v63 = vpop.eup %4206  ;;  %v3202_v0 = vmul.f32 -1.442695, %v613_v62 }
 0x1a1   :  { %v622_v1 = vadd.f32 1.0, %v4207_v63 }
 0x1a2   :  { %4208 = vpow2.f32 %v3202_v0 }
 0x1a3   :  { %4210 = vrcp.f32 %v622_v1  ;;  %v635_v11 = vand.u32 2147483648, %v622_v1  ;;  %vm629_vm13 = vweird.f32 %v622_v1  ;;  %v633_v13 = vand.u32 2147483647, %v622_v1 }
 0x1a5   :  { %v636_v16 = vor.u32 1.1754944e-38, %v635_v11  ;;  %vm634_vm15 = vcmp.eq.f32.partialorder %v633_v13, 8.507059e+37 }
 0x1a8   :  { %v4209_v2 = vpop.eup %4208 }
 0x1a9   :  { %v4211_v3 = vpop.eup %4210  ;;  %v623_v4 = vadd.f32 1.0, %v4209_v2 }
 0x1aa   :  { %v625_v5 = vmul.f32 %v4211_v3, %v622_v1  ;;  %vm630_vm12 = vweird.f32 %v4211_v3 }
 0x1ab   :  { %4212 = vrcp.f32 %v623_v4  ;;  %vm631_vm14 = vmor %vm629_vm13, %vm630_vm12  ;;  %v650_v17 = vand.u32 2147483648, %v623_v4  ;;  %v648_v19 = vand.u32 2147483647, %v623_v4  ;;  %vm644_vm1 = vweird.f32 %v623_v4 }
 0x1ac   :  { %v626_v6 = vsub.f32 1.0, %v625_v5 }
 0x1ad   :  { %v651_v23 = vor.u32 1.1754944e-38, %v650_v17  ;;  %vm649_vm3 = vcmp.eq.f32.partialorder %v648_v19, 8.507059e+37 }
 0x1ae   :  { %v627_v7 = vmul.f32 %v4211_v3, %v626_v6 }
 0x1b0   :  { %v628_v8 = vadd.f32 %v4211_v3, %v627_v7 }
 0x1b1   :  { %v4213_v9 = vpop.eup %4212 }
 0x1b2   :  { %v640_v12 = vmul.f32 %v4213_v9, %v623_v4  ;;  %v632_v15 = vsel %vm631_vm14, %v4211_v3, %v628_v8  ;;  %vm645_vm0 = vweird.f32 %v4213_v9 }
 0x1b3   :  { %v637_v20 = vsel %vm634_vm15, %v636_v16, %v632_v15  ;;  %vm646_vm2 = vmor %vm644_vm1, %vm645_vm0 }
 0x1b4   :  { %v641_v14 = vsub.f32 1.0, %v640_v12  ;;  %v654_v25 = vmul.f32 %v637_v20, %v533_v10 }
 0x1b6   :  { %v642_v18 = vmul.f32 %v4213_v9, %v641_v14  ;;  %v4783_v31 = vadd.f32 %v654_v25, %v457_v28  ;;  %v4028_v28 = vld [vmem:[#allocation17 + $0x28] sm:$0xff] }
 0x1b8   :  { %v643_v21 = vadd.f32 %v4213_v9, %v642_v18  ;;  %v658_v19 = vmul.f32 0.70710677, %v4783_v31 }
 0x1ba   :  { %v647_v24 = vsel %vm646_vm2, %v4213_v9, %v643_v21 }
 0x1bb   :  { %v652_v27 = vsel %vm649_vm3, %v651_v23, %v647_v24 }
 0x1bc   :  { %v655_v30 = vmul.f32 %v652_v27, %v535_v26  ;;  %v4030_v26 = vld [vmem:[#allocation17 + $0x38] sm:$0xff]  ;;  %v4029_v27 = vld [vmem:[#allocation17 + $0x30] sm:$0xff] }
 0x1bd   :  { %1125 = vmatpush.bf16.msra.mxu0 %v4030_v26 }
 0x1be   :  { %v4785_v32 = vadd.f32 %v655_v30, %v458_v29  ;;  %v4027_v29 = vld [vmem:[#allocation17 + $0x20] sm:$0xff]  ;;  %v4026_v30 = vld [vmem:[#allocation17 + $0x18] sm:$0xff] }
 0x1c0   :  { %v660_v33 = vpack.c.bf16 %v4785_v32, %v4783_v31  ;;  %v659_v20 = vmul.f32 0.70710677, %v4785_v32  ;;  %v4025_v31 = vld [vmem:[#allocation17 + $0x10] sm:$0xff] }
 0x1c1   :  { %1126 = vmatpush.bf16.msra.mxu0 %v4029_v27 }
 0x1c2   :  { %733 = vmatmul.bf16.vlgmr.msrb.gmra.mxu0 %v660_v33  ;;  %811 = vmatmul.bf16.vlgmr.msrb.gmra.mxu1 %v660_v33  ;;  %v4024_v33 = vld [vmem:[#allocation17 + $0x8] sm:$0xff] }
 0x1c5   :  { %1127 = vmatpush.bf16.msra.mxu0 %v4028_v28 }
 0x1c9   :  { %1128 = vmatpush.bf16.msra.mxu0 %v4027_v29 }
 0x1cd   :  { %1129 = vmatpush.bf16.msra.mxu0 %v4026_v30 }
 0x1d1   :  { %1130 = vmatpush.bf16.msra.mxu0 %v4025_v31 }
 0x1d5   :  { %1131 = vmatpush.bf16.msra.mxu0 %v4024_v33 }
 0x1d9   :  { %1132 = vmatpush.bf16.msra.mxu0 %v4023_v35 }
 0x23f   :  { %v812_v46 = vpop.f32.mrf.mxu1  ;;  %v734_v2 = vpop.f32.mrf.mxu0 }
 0x240   :  { %v3267_v49 = vmul.f32 -1.442695, %v812_v46 }
 0x242   :  { %4214 = vpow2.f32 %v3267_v49 }
 0x247   :  { %v814_v52 = vpop.f32.mrf.mxu1  ;;  %v736_v17 = vpop.f32.mrf.mxu0 }
 0x248   :  { %v4215_v55 = vpop.eup %4214  ;;  %v3268_v56 = vmul.f32 -1.442695, %v814_v52 }
 0x249   :  { %v823_v57 = vadd.f32 1.0, %v4215_v55 }
 0x24a   :  { %4216 = vpow2.f32 %v3268_v56 }
 0x24b   :  { %4218 = vrcp.f32 %v823_v57  ;;  %v836_v3 = vand.u32 2147483648, %v823_v57  ;;  %vm830_vm5 = vweird.f32 %v823_v57  ;;  %v834_v5 = vand.u32 2147483647, %v823_v57 }
 0x24d   :  { %v837_v8 = vor.u32 1.1754944e-38, %v836_v3  ;;  %vm835_vm7 = vcmp.eq.f32.partialorder %v834_v5, 8.507059e+37 }
 0x250   :  { %v4217_v58 = vpop.eup %4216 }
 0x251   :  { %v4219_v59 = vpop.eup %4218  ;;  %v824_v60 = vadd.f32 1.0, %v4217_v58 }
 0x252   :  { %v826_v61 = vmul.f32 %v4219_v59, %v823_v57  ;;  %vm831_vm4 = vweird.f32 %v4219_v59 }
 0x253   :  { %4220 = vrcp.f32 %v824_v60  ;;  %vm832_vm6 = vmor %vm830_vm5, %vm831_vm4  ;;  %v851_v9 = vand.u32 2147483648, %v824_v60  ;;  %v849_v11 = vand.u32 2147483647, %v824_v60  ;;  %vm845_vm9 = vweird.f32 %v824_v60 }
 0x254   :  { %v827_v62 = vsub.f32 1.0, %v826_v61 }
 0x255   :  { %v852_v14 = vor.u32 1.1754944e-38, %v851_v9  ;;  %vm850_vm11 = vcmp.eq.f32.partialorder %v849_v11, 8.507059e+37 }
 0x256   :  { %v828_v63 = vmul.f32 %v4219_v59, %v827_v62 }
 0x258   :  { %v829_v0 = vadd.f32 %v4219_v59, %v828_v63 }
 0x259   :  { %v4221_v1 = vpop.eup %4220 }
 0x25a   :  { %v841_v4 = vmul.f32 %v4221_v1, %v824_v60  ;;  %v833_v7 = vsel %vm832_vm6, %v4219_v59, %v829_v0  ;;  %vm846_vm8 = vweird.f32 %v4221_v1 }
 0x25b   :  { %v838_v12 = vsel %vm835_vm7, %v837_v8, %v833_v7  ;;  %vm847_vm10 = vmor %vm845_vm9, %vm846_vm8 }
 0x25c   :  { %v842_v6 = vsub.f32 1.0, %v841_v4  ;;  %v855_v16 = vmul.f32 %v838_v12, %v734_v2 }
 0x25e   :  { %v843_v10 = vmul.f32 %v4221_v1, %v842_v6  ;;  %v4791_v23 = vadd.f32 %v855_v16, %v658_v19 }
 0x260   :  { %v844_v13 = vadd.f32 %v4221_v1, %v843_v10  ;;  %v859_v3 = vmul.f32 0.70710677, %v4791_v23 }
 0x262   :  { %v848_v15 = vsel %vm847_vm10, %v4221_v1, %v844_v13 }
 0x263   :  { %v853_v18 = vsel %vm850_vm11, %v852_v14, %v848_v15 }
 0x264   :  { %v856_v21 = vmul.f32 %v853_v18, %v736_v17 }
 0x266   :  { %v4793_v24 = vadd.f32 %v856_v21, %v659_v20 }
 0x268   :  { %v861_v25 = vpack.c.bf16 %v4793_v24, %v4791_v23  ;;  %v860_v4 = vmul.f32 0.70710677, %v4793_v24 }
 0x26a   :  { %934 = vmatmul.bf16.vlgmr.msrb.gmra.mxu2 %v861_v25  ;;  %1012 = vmatmul.bf16.vlgmr.msrb.gmra.mxu3 %v861_v25 }
 0x2ed   :  { %v1013_v32 = vpop.f32.mrf.mxu3  ;;  %v935_v48 = vpop.f32.mrf.mxu2 }
 0x2ee   :  { %v3333_v34 = vmul.f32 -1.442695, %v1013_v32 }
 0x2f0   :  { %4222 = vpow2.f32 %v3333_v34  ;;  %v255_v34 = vlaneseq }
 0x2f5   :  { %v1015_v36 = vpop.f32.mrf.mxu3  ;;  %v937_v1 = vpop.f32.mrf.mxu2 }
 0x2f6   :  { %v4223_v37 = vpop.eup %4222  ;;  %v3334_v38 = vmul.f32 -1.442695, %v1015_v36 }
 0x2f7   :  { %v1024_v39 = vadd.f32 1.0, %v4223_v37  ;;  %v256_v37 = vand.u32 127, %v255_v34  ;;  %v4048_v34 = vld [vmem:[#allocation8 + $0x48] sm:$0xff] }
 0x2f8   :  { %4224 = vpow2.f32 %v3334_v38 }
 0x2f9   :  { %4226 = vrcp.f32 %v1024_v39  ;;  %v1037_v49 = vand.u32 2147483648, %v1024_v39  ;;  %vm1031_vm13 = vweird.f32 %v1024_v39  ;;  %v1035_v51 = vand.u32 2147483647, %v1024_v39 }
 0x2fa   :  { %vm257_vm5 = vcmp.lt.s32.totalorder %v256_v37, 32 }
 0x2fb   :  { %v1038_v56 = vor.u32 1.1754944e-38, %v1037_v49  ;;  %vm1036_vm0 = vcmp.eq.f32.partialorder %v1035_v51, 8.507059e+37  ;;  %v4046_v49 = vld [vmem:[#allocation7 + $0x78] sm:$0xff]  ;;  %v4045_v51 = vld [vmem:[#allocation7 + $0x70] sm:$0xff] }
 0x2fc   :  { %1341 = vmatpush.bf16.msra.mxu2 %v4046_v49 }
 0x2fe   :  { %v4225_v40 = vpop.eup %4224 }
 0x2ff   :  { %v4227_v41 = vpop.eup %4226  ;;  %v1025_v42 = vadd.f32 1.0, %v4225_v40 }
 0x300   :  { %v1027_v43 = vmul.f32 %v4227_v41, %v1024_v39  ;;  %vm1032_vm12 = vweird.f32 %v4227_v41  ;;  %1342 = vmatpush.bf16.msra.mxu2 %v4045_v51 }
 0x301   :  { %4228 = vrcp.f32 %v1025_v42  ;;  %vm1033_vm14 = vmor %vm1031_vm13, %vm1032_vm12  ;;  %v1052_v57 = vand.u32 2147483648, %v1025_v42  ;;  %v1050_v59 = vand.u32 2147483647, %v1025_v42  ;;  %vm1046_vm1 = vweird.f32 %v1025_v42 }
 0x302   :  { %v1028_v44 = vsub.f32 1.0, %v1027_v43 }
 0x303   :  { %v1053_v62 = vor.u32 1.1754944e-38, %v1052_v57  ;;  %vm1051_vm3 = vcmp.eq.f32.partialorder %v1050_v59, 8.507059e+37 }
 0x304   :  { %v1029_v45 = vmul.f32 %v4227_v41, %v1028_v44 }
 0x306   :  { %v1030_v46 = vadd.f32 %v4227_v41, %v1029_v45 }
 0x307   :  { %v4229_v47 = vpop.eup %4228 }
 0x308   :  { %v1042_v50 = vmul.f32 %v4229_v47, %v1025_v42  ;;  %v1034_v55 = vsel %vm1033_vm14, %v4227_v41, %v1030_v46  ;;  %vm1047_vm15 = vweird.f32 %v4229_v47  ;;  %v4632_v41 = vmov 0.0  }
 0x309   :  { %v1039_v60 = vsel %vm1036_vm0, %v1038_v56, %v1034_v55  ;;  %vm1048_vm2 = vmor %vm1046_vm1, %vm1047_vm15  ;;  %v4801_v42 = vsel %vm257_vm5, 1.0, %v4632_v41  ;;  %v4044_v55 = vld [vmem:[#allocation7 + $0x68] sm:$0xff] }
 0x30a   :  { %v1043_v52 = vsub.f32 1.0, %v1042_v50  ;;  %v1056_v0 = vmul.f32 %v1039_v60, %v935_v48  ;;  %v4038_v48 = vld [vmem:[#allocation5 + $0x78] sm:$0xff]  ;;  %v4037_v50 = vld [vmem:[#allocation5 + $0x70] sm:$0xff]  ;;  %1343 = vmatpush.bf16.msra.mxu2 %v4044_v55 }
 0x30b   :  { %1262 = vmatpush.bf16.msra.mxu1 %v4038_v48 }
 0x30c   :  { %v1044_v58 = vmul.f32 %v4229_v47, %v1043_v52  ;;  %v1058_v6 = vadd.f32 %v1056_v0, %v859_v3  ;;  %v4036_v52 = vld [vmem:[#allocation5 + $0x68] sm:$0xff]  ;;  %v4043_v3 = vld [vmem:[#allocation7 + $0x60] sm:$0xff] }
 0x30e   :  { %v1045_v61 = vadd.f32 %v4229_v47, %v1044_v58  ;;  %1344 = vmatpush.bf16.msra.mxu2 %v4043_v3 }
 0x30f   :  { %1263 = vmatpush.bf16.msra.mxu1 %v4037_v50 }
 0x310   :  { %v1049_v63 = vsel %vm1048_vm2, %v4229_v47, %v1045_v61 }
 0x311   :  { %v1054_v2 = vsel %vm1051_vm3, %v1053_v62, %v1049_v63 }
 0x312   :  { %v1057_v5 = vmul.f32 %v1054_v2, %v937_v1  ;;  %v4035_v2 = vld [vmem:[#allocation5 + $0x60] sm:$0xff] }
 0x313   :  { %1264 = vmatpush.bf16.msra.mxu1 %v4036_v52 }
 0x314   :  { %v1059_v7 = vadd.f32 %v1057_v5, %v860_v4  ;;  %v4034_v4 = vld [vmem:[#allocation5 + $0x58] sm:$0xff] }
 0x315   :  { %v4042_v5 = vld [vmem:[#allocation7 + $0x58] sm:$0xff] }
 0x316   :  { %v1060_v8 = vpack.c.bf16 %v1059_v7, %v1058_v6  ;;  %1345 = vmatpush.bf16.msra.mxu2 %v4042_v5  ;;  %v4033_v6 = vld [vmem:[#allocation5 + $0x50] sm:$0xff] }
 0x317   :  { %1265 = vmatpush.bf16.msra.mxu1 %v4035_v2  ;;  %v4041_v7 = vld [vmem:[#allocation7 + $0x50] sm:$0xff] }
 0x318   :  { %1133 = vmatmul.bf16.vlgmr.msra.gmra.mxu0 %v1060_v8  ;;  %v4032_v8 = vld [vmem:[#allocation5 + $0x48] sm:$0xff] }
 0x31a   :  { %1346 = vmatpush.bf16.msra.mxu2 %v4041_v7 }
 0x31b   :  { %1266 = vmatpush.bf16.msra.mxu1 %v4034_v4 }
 0x31f   :  { %1267 = vmatpush.bf16.msra.mxu1 %v4033_v6 }
 0x323   :  { %1268 = vmatpush.bf16.msra.mxu1 %v4032_v8 }
 0x395   :  { %v1134_v9 = vpop.f32.mrf.mxu0 }
 0x39d   :  { %v1136_v10 = vpop.f32.mrf.mxu0 }
 0x39e   :  { %v1139_v11 = vadd.f32 %v1136_v10, %v1134_v9 }
 0x3a0   :  { %v1140_v12 = vrot.slane %v1139_v11, 4 }
 0x3a2   :  { %v1141_v13 = vadd.f32 %v1140_v12, %v1139_v11  ;;  %v4039_v11 = vld [vmem:[#allocation7 + $0x40] sm:$0xff] }
 0x3a4   :  { %v1142_v14 = vrot.slane %v1141_v13, 2 }
 0x3a6   :  { %v1143_v15 = vadd.f32 %v1142_v14, %v1141_v13 }
 0x3a8   :  { %v1144_v16 = vrot.slane %v1143_v15, 1 }
 0x3aa   :  { %v1145_v17 = vadd.f32 %v1144_v16, %v1143_v15 }
 0x3ac   :  { %v1146_v18 = vmul.f32 %v1145_v17, %v4765_v22 }
 0x3ae   :  { %v1148_v19 = vsub.f32 %v1136_v10, %v1146_v18  ;;  %v1147_v20 = vsub.f32 %v1134_v9, %v1146_v18  ;;  %v4040_v9 = vld [vmem:[#allocation7 + $0x48] sm:$0xff]  ;;  %v4031_v10 = vld [vmem:[#allocation5 + $0x40] sm:$0xff] }
 0x3af   :  { %1347 = vmatpush.bf16.msra.mxu2 %v4040_v9  ;;  %1269 = vmatpush.bf16.msra.mxu1 %v4031_v10  ;;  %v4070_v10 = vld [vmem:[#allocation11 + $0x78] sm:$0xff] }
 0x3b0   :  { %v1150_v21 = vmul.f32 %v1148_v19, %v1148_v19  ;;  %v1149_v23 = vmul.f32 %v1147_v20, %v1147_v20 }
 0x3b2   :  { %v1151_v24 = vadd.f32 %v1150_v21, %v1149_v23  ;;  %v4054_v21 = vld [vmem:[#allocation8 + $0x78] sm:$0xff] }
 0x3b3   :  { %1348 = vmatpush.bf16.msra.mxu2 %v4039_v11  ;;  %v4062_v23 = vld [vmem:[#allocation10 + $0x78] sm:$0xff]  ;;  %1463 = vmatpush.bf16.msra.mxu3 %v4054_v21 }
 0x3b4   :  { %v1152_v25 = vrot.slane %v1151_v24, 4  ;;  %1542 = vmatpush.bf16.msrb.mxu0 %v4062_v23  ;;  %v4078_v11 = vld [vmem:[#allocation13 + $0x78] sm:$0xff]  ;;  %1666 = vmatpush.bf16.msrb.mxu1 %v4070_v10  ;;  %v4065_v23 = vld [vmem:[#allocation11 + $0x50] sm:$0xff] }
 0x3b5   :  { %v4074_v21 = vld [vmem:[#allocation13 + $0x58] sm:$0xff]  ;;  %v4093_v10 = vld [vmem:[#allocation16 + $0x70] sm:$0xff] }
 0x3b6   :  { %v1153_v26 = vadd.f32 %v1152_v25, %v1151_v24  ;;  %v4053_v24 = vld [vmem:[#allocation8 + $0x70] sm:$0xff] }
 0x3b7   :  { %v4061_v25 = vld [vmem:[#allocation10 + $0x70] sm:$0xff]  ;;  %1464 = vmatpush.bf16.msra.mxu3 %v4053_v24  ;;  %1745 = vmatpush.bf16.msrb.mxu2 %v4078_v11  ;;  %v4083_v11 = vld [vmem:[#allocation14 + $0x60] sm:$0xff] }
 0x3b8   :  { %v1154_v27 = vrot.slane %v1153_v26, 2  ;;  %1543 = vmatpush.bf16.msrb.mxu0 %v4061_v25  ;;  %v4073_v24 = vld [vmem:[#allocation13 + $0x50] sm:$0xff] }
 0x3ba   :  { %v1155_v28 = vadd.f32 %v1154_v27, %v1153_v26  ;;  %v4052_v26 = vld [vmem:[#allocation8 + $0x68] sm:$0xff] }
 0x3bb   :  { %v4060_v27 = vld [vmem:[#allocation10 + $0x68] sm:$0xff]  ;;  %1465 = vmatpush.bf16.msra.mxu3 %v4052_v26 }
 0x3bc   :  { %v1156_v29 = vrot.slane %v1155_v28, 1  ;;  %1544 = vmatpush.bf16.msrb.mxu0 %v4060_v27  ;;  %v4064_v27 = vld [vmem:[#allocation11 + $0x48] sm:$0xff] }
 0x3be   :  { %v1157_v30 = vadd.f32 %v1156_v29, %v1155_v28  ;;  %v4051_v28 = vld [vmem:[#allocation8 + $0x60] sm:$0xff] }
 0x3bf   :  { %v4059_v29 = vld [vmem:[#allocation10 + $0x60] sm:$0xff]  ;;  %1466 = vmatpush.bf16.msra.mxu3 %v4051_v28  ;;  %v4072_v28 = vld [vmem:[#allocation13 + $0x48] sm:$0xff] }
 0x3c0   :  { %v1158_v31 = vmul.f32 %v1157_v30, %v4765_v22  ;;  %1545 = vmatpush.bf16.msrb.mxu0 %v4059_v29  ;;  %v4050_v30 = vld [vmem:[#allocation8 + $0x58] sm:$0xff]  ;;  %v4063_v29 = vld [vmem:[#allocation11 + $0x40] sm:$0xff] }
 0x3c2   :  { %v1159_v32 = vadd.f32 1e-05, %v1158_v31  ;;  %v4058_v31 = vld [vmem:[#allocation10 + $0x58] sm:$0xff] }
 0x3c3   :  { %1467 = vmatpush.bf16.msra.mxu3 %v4050_v30  ;;  %v4071_v30 = vld [vmem:[#allocation13 + $0x40] sm:$0xff] }
 0x3c4   :  { %4230 = vrsqrt.f32 %v1159_v32  ;;  %vm1166_vm6 = vweird.f32 %v1159_v32  ;;  %1546 = vmatpush.bf16.msrb.mxu0 %v4058_v31 }
 0x3ca   :  { %v4231_v33 = vpop.eup %4230 }
 0x3cb   :  { %v1161_v35 = vmul.f32 %v4231_v33, %v1159_v32  ;;  %vm1167_vm4 = vweird.f32 %v4231_v33  ;;  %v4049_v32 = vld [vmem:[#allocation8 + $0x50] sm:$0xff] }
 0x3cc   :  { %vm1168_vm7 = vmor %vm1166_vm6, %vm1167_vm4  ;;  %1468 = vmatpush.bf16.msra.mxu3 %v4049_v32 }
 0x3cd   :  { %v1162_v36 = vmul.f32 %v4231_v33, %v1161_v35  ;;  %v4056_v35 = vld [vmem:[#allocation10 + $0x48] sm:$0xff] }
 0x3cf   :  { %v1163_v38 = vmul.f32 0.5, %v1162_v36 }
 0x3d0   :  { %1469 = vmatpush.bf16.msra.mxu3 %v4048_v34 }
 0x3d1   :  { %v1164_v39 = vsub.f32 1.5, %v1163_v38  ;;  %v4047_v38 = vld [vmem:[#allocation8 + $0x40] sm:$0xff] }
 0x3d3   :  { %v1165_v40 = vmul.f32 %v4231_v33, %v1164_v39  ;;  %v4055_v39 = vld [vmem:[#allocation10 + $0x40] sm:$0xff] }
 0x3d4   :  { %1470 = vmatpush.bf16.msra.mxu3 %v4047_v38 }
 0x3d5   :  { %v1169_v43 = vsel %vm1168_vm7, %v4231_v33, %v1165_v40  ;;  %v4057_v33 = vld [vmem:[#allocation10 + $0x50] sm:$0xff] }
 0x3d6   :  { %v1170_v44 = vmul.f32 %v1169_v43, %v1147_v20  ;;  %v1171_v46 = vmul.f32 %v1169_v43, %v1148_v19  ;;  %1547 = vmatpush.bf16.msrb.mxu0 %v4057_v33 }
 0x3d8   :  { %v1172_v45 = vmul.f32 %v4801_v42, %v1170_v44  ;;  %v1173_v47 = vmul.f32 %v4801_v42, %v1171_v46 }
 0x3da   :  { %1174 = vmax.xlane.f32.xlu0 %v1172_v45  ;;  %1548 = vmatpush.bf16.msrb.mxu0 %v4056_v35 }
 0x3de   :  { %1549 = vmatpush.bf16.msrb.mxu0 %v4055_v39 }
 0x3e2   :  { %1176 = vmax.xlane.f32.xlu0 %v1173_v47 }
 0x44d   :  { %v1175_v56 = vpop.xlane.xlu0 %1174 }
 0x44e   :  { %v1178_v57 = vsub.f32 %v1172_v45, %v1175_v56 }
 0x450   :  { %v1180_v58 = vmul.f32 1.442695, %v1178_v57 }
 0x452   :  { %4232 = vpow2.f32 %v1180_v58 }
 0x455   :  { %v1177_v59 = vpop.xlane.xlu0 %1176 }
 0x456   :  { %v1179_v60 = vsub.f32 %v1173_v47, %v1177_v59 }
 0x458   :  { %v4233_v61 = vpop.eup %4232  ;;  %v1182_v62 = vmul.f32 1.442695, %v1179_v60 }
 0x459   :  { %v1184_v63 = vmul.f32 %v4233_v61, %v4801_v42 }
 0x45a   :  { %4234 = vpow2.f32 %v1182_v62 }
 0x45b   :  { %1186 = vadd.xlane.f32.xlu1 %v1184_v63 }
 0x460   :  { %v4235_v0 = vpop.eup %4234 }
 0x461   :  { %v1185_v1 = vmul.f32 %v4235_v0, %v4801_v42 }
 0x463   :  { %1188 = vadd.xlane.f32.xlu1 %v1185_v1 }
 0x4ce   :  { %v1187_v12 = vpop.xlane.xlu1 %1186 }
 0x4cf   :  { %4236 = vrcp.f32 %v1187_v12  ;;  %v4069_v12 = vld [vmem:[#allocation11 + $0x70] sm:$0xff] }
 0x4d0   :  { %1667 = vmatpush.bf16.msrb.mxu1 %v4069_v12  ;;  %v4091_v12 = vld [vmem:[#allocation16 + $0x60] sm:$0xff] }
 0x4d5   :  { %v4237_v14 = vpop.eup %4236 }
 0x4d6   :  { %v1189_v13 = vpop.xlane.xlu1 %1188  ;;  %v4807_v15 = vmul.f32 %v4237_v14, %v1184_v63  ;;  %v4068_v14 = vld [vmem:[#allocation11 + $0x68] sm:$0xff] }
 0x4d7   :  { %4238 = vrcp.f32 %v1189_v13  ;;  %v4077_v13 = vld [vmem:[#allocation13 + $0x70] sm:$0xff]  ;;  %1668 = vmatpush.bf16.msrb.mxu1 %v4068_v14  ;;  %v4090_v14 = vld [vmem:[#allocation16 + $0x58] sm:$0xff] }
 0x4d8   :  { %v1194_v18 = vmul.f32 %v4807_v15, %v4769_v53  ;;  %1746 = vmatpush.bf16.msrb.mxu2 %v4077_v13  ;;  %v4082_v13 = vld [vmem:[#allocation14 + $0x58] sm:$0xff] }
 0x4dd   :  { %v4239_v16 = vpop.eup %4238 }
 0x4de   :  { %v4809_v17 = vmul.f32 %v4239_v16, %v1185_v1  ;;  %v4076_v16 = vld [vmem:[#allocation13 + $0x68] sm:$0xff] }
 0x4df   :  { %1747 = vmatpush.bf16.msrb.mxu2 %v4076_v16  ;;  %v4081_v16 = vld [vmem:[#allocation14 + $0x50] sm:$0xff] }
 0x4e0   :  { %v1195_v19 = vmul.f32 %v4809_v17, %v4771_v54 }
 0x4e2   :  { %v1196_v20 = vpack.c.bf16 %v1195_v19, %v1194_v18  ;;  %v4067_v18 = vld [vmem:[#allocation11 + $0x60] sm:$0xff] }
 0x4e3   :  { %v4075_v19 = vld [vmem:[#allocation13 + $0x60] sm:$0xff]  ;;  %1669 = vmatpush.bf16.msrb.mxu1 %v4067_v18  ;;  %v4089_v18 = vld [vmem:[#allocation16 + $0x50] sm:$0xff] }
 0x4e4   :  { %1270 = vmatmul.bf16.vlgmr.msra.gmra.mxu1 %v1196_v20  ;;  %1349 = vmatmul.bf16.vlgmr.msra.gmra.mxu2 %v1196_v20  ;;  %v4066_v20 = vld [vmem:[#allocation11 + $0x58] sm:$0xff] }
 0x4e5   :  { %1748 = vmatpush.bf16.msrb.mxu2 %v4075_v19 }
 0x4e7   :  { %1670 = vmatpush.bf16.msrb.mxu1 %v4066_v20  ;;  %v4080_v20 = vld [vmem:[#allocation14 + $0x48] sm:$0xff] }
 0x4e9   :  { %1749 = vmatpush.bf16.msrb.mxu2 %v4074_v21  ;;  %v4088_v21 = vld [vmem:[#allocation16 + $0x48] sm:$0xff] }
 0x4eb   :  { %1671 = vmatpush.bf16.msrb.mxu1 %v4065_v23 }
 0x4ed   :  { %1750 = vmatpush.bf16.msrb.mxu2 %v4073_v24  ;;  %v4079_v24 = vld [vmem:[#allocation14 + $0x40] sm:$0xff] }
 0x4ef   :  { %1672 = vmatpush.bf16.msrb.mxu1 %v4064_v27 }
 0x4f1   :  { %1751 = vmatpush.bf16.msrb.mxu2 %v4072_v28 }
 0x4f3   :  { %1673 = vmatpush.bf16.msrb.mxu1 %v4063_v29 }
 0x4f5   :  { %1752 = vmatpush.bf16.msrb.mxu2 %v4071_v30 }
 0x561   :  { %v1271_v52 = vpop.f32.mrf.mxu1 }
 0x567   :  { %v1350_v36 = vpop.f32.mrf.mxu2 }
 0x568   :  { %v3431_v37 = vmul.f32 -1.442695, %v1350_v36 }
 0x569   :  { %v1273_v5 = vpop.f32.mrf.mxu1 }
 0x56a   :  { %4240 = vpow2.f32 %v3431_v37 }
 0x56f   :  { %v1352_v40 = vpop.f32.mrf.mxu2 }
 0x570   :  { %v4241_v41 = vpop.eup %4240  ;;  %v3432_v43 = vmul.f32 -1.442695, %v1352_v40 }
 0x571   :  { %v1361_v44 = vadd.f32 1.0, %v4241_v41 }
 0x572   :  { %4242 = vpow2.f32 %v3432_v43 }
 0x573   :  { %4244 = vrcp.f32 %v1361_v44  ;;  %v1374_v57 = vand.u32 2147483648, %v1361_v44  ;;  %vm1368_vm9 = vweird.f32 %v1361_v44  ;;  %v1372_v59 = vand.u32 2147483647, %v1361_v44 }
 0x575   :  { %v1375_v0 = vor.u32 1.1754944e-38, %v1374_v57  ;;  %vm1373_vm13 = vcmp.eq.f32.partialorder %v1372_v59, 8.507059e+37 }
 0x578   :  { %v4243_v45 = vpop.eup %4242 }
 0x579   :  { %v4245_v46 = vpop.eup %4244  ;;  %v1362_v47 = vadd.f32 1.0, %v4243_v45 }
 0x57a   :  { %v1364_v48 = vmul.f32 %v4245_v46, %v1361_v44  ;;  %vm1369_vm8 = vweird.f32 %v4245_v46 }
 0x57b   :  { %4246 = vrcp.f32 %v1362_v47  ;;  %v1389_v60 = vand.u32 2147483648, %v1362_v47  ;;  %vm1370_vm10 = vmor %vm1368_vm9, %vm1369_vm8  ;;  %v1387_v63 = vand.u32 2147483647, %v1362_v47  ;;  %vm1383_vm12 = vweird.f32 %v1362_v47 }
 0x57c   :  { %v1365_v49 = vsub.f32 1.0, %v1364_v48 }
 0x57d   :  { %v1390_v3 = vor.u32 1.1754944e-38, %v1389_v60  ;;  %vm1388_vm15 = vcmp.eq.f32.partialorder %v1387_v63, 8.507059e+37 }
 0x57e   :  { %v1366_v50 = vmul.f32 %v4245_v46, %v1365_v49 }
 0x580   :  { %v1367_v56 = vadd.f32 %v4245_v46, %v1366_v50 }
 0x581   :  { %v4247_v51 = vpop.eup %4246 }
 0x582   :  { %v1379_v55 = vmul.f32 %v4247_v51, %v1362_v47  ;;  %v1371_v62 = vsel %vm1370_vm10, %v4245_v46, %v1367_v56  ;;  %vm1384_vm11 = vweird.f32 %v4247_v51 }
 0x583   :  { %v1376_v2 = vsel %vm1373_vm13, %v1375_v0, %v1371_v62  ;;  %vm1385_vm14 = vmor %vm1383_vm12, %vm1384_vm11 }
 0x584   :  { %v1380_v58 = vsub.f32 1.0, %v1379_v55  ;;  %v4815_v7 = vmul.f32 %v1376_v2, %v1271_v52 }
 0x586   :  { %v1381_v61 = vmul.f32 %v4247_v51, %v1380_v58  ;;  %v1395_v63 = vmul.f32 0.70710677, %v4815_v7 }
 0x588   :  { %v1382_v1 = vadd.f32 %v4247_v51, %v1381_v61 }
 0x58a   :  { %v1386_v4 = vsel %vm1385_vm14, %v4247_v51, %v1382_v1 }
 0x58b   :  { %v1391_v6 = vsel %vm1388_vm15, %v1390_v3, %v1386_v4 }
 0x58c   :  { %v4817_v8 = vmul.f32 %v1391_v6, %v1273_v5  ;;  %v4086_v5 = vld [vmem:[#allocation14 + $0x78] sm:$0xff] }
 0x58d   :  { %v4094_v6 = vld [vmem:[#allocation16 + $0x78] sm:$0xff]  ;;  %1869 = vmatpush.bf16.msrb.mxu3 %v4086_v5  ;;  %v4099_v5 = vld [vmem:[#allocation17 + $0x60] sm:$0xff] }
 0x58e   :  { %v1397_v9 = vpack.c.bf16 %v4817_v8, %v4815_v7  ;;  %v1396_v0 = vmul.f32 0.70710677, %v4817_v8  ;;  %1948 = vmatpush.bf16.msra.mxu0 %v4094_v6  ;;  %v4084_v7 = vld [vmem:[#allocation14 + $0x68] sm:$0xff] }
 0x58f   :  { %v4092_v8 = vld [vmem:[#allocation16 + $0x68] sm:$0xff] }
 0x590   :  { %1471 = vmatmul.bf16.vlgmr.msra.gmra.mxu3 %v1397_v9  ;;  %1550 = vmatmul.bf16.vlgmr.msrb.gmra.mxu0 %v1397_v9  ;;  %v4085_v9 = vld [vmem:[#allocation14 + $0x70] sm:$0xff] }
 0x591   :  { %1870 = vmatpush.bf16.msrb.mxu3 %v4085_v9 }
 0x592   :  { %1949 = vmatpush.bf16.msra.mxu0 %v4093_v10  ;;  %v4096_v10 = vld [vmem:[#allocation17 + $0x48] sm:$0xff] }
 0x595   :  { %1871 = vmatpush.bf16.msrb.mxu3 %v4084_v7  ;;  %v4095_v7 = vld [vmem:[#allocation17 + $0x40] sm:$0xff] }
 0x596   :  { %1950 = vmatpush.bf16.msra.mxu0 %v4092_v8 }
 0x599   :  { %1872 = vmatpush.bf16.msrb.mxu3 %v4083_v11 }
 0x59a   :  { %1951 = vmatpush.bf16.msra.mxu0 %v4091_v12 }
 0x59d   :  { %1873 = vmatpush.bf16.msrb.mxu3 %v4082_v13 }
 0x59e   :  { %1952 = vmatpush.bf16.msra.mxu0 %v4090_v14 }
 0x5a1   :  { %1874 = vmatpush.bf16.msrb.mxu3 %v4081_v16 }
 0x5a2   :  { %1953 = vmatpush.bf16.msra.mxu0 %v4089_v18 }
 0x5a5   :  { %1875 = vmatpush.bf16.msrb.mxu3 %v4080_v20 }
 0x5a6   :  { %1954 = vmatpush.bf16.msra.mxu0 %v4088_v21 }
 0x5a9   :  { %1876 = vmatpush.bf16.msrb.mxu3 %v4079_v24 }
 0x60d   :  { %v1551_v25 = vpop.f32.mrf.mxu0 }
 0x60e   :  { %v3497_v26 = vmul.f32 -1.442695, %v1551_v25  ;;  %v4087_v25 = vld [vmem:[#allocation16 + $0x40] sm:$0xff] }
 0x60f   :  { %1955 = vmatpush.bf16.msra.mxu0 %v4087_v25 }
 0x610   :  { %4248 = vpow2.f32 %v3497_v26 }
 0x613   :  { %v1472_v44 = vpop.f32.mrf.mxu3 }
 0x615   :  { %v1553_v31 = vpop.f32.mrf.mxu0 }
 0x616   :  { %v4249_v32 = vpop.eup %4248  ;;  %v3498_v33 = vmul.f32 -1.442695, %v1553_v31 }
 0x617   :  { %v1562_v34 = vadd.f32 1.0, %v4249_v32 }
 0x618   :  { %4250 = vpow2.f32 %v3498_v33 }
 0x619   :  { %4252 = vrcp.f32 %v1562_v34  ;;  %v1575_v45 = vand.u32 2147483648, %v1562_v34  ;;  %vm1569_vm1 = vweird.f32 %v1562_v34  ;;  %v1573_v46 = vand.u32 2147483647, %v1562_v34 }
 0x61b   :  { %v1576_v50 = vor.u32 1.1754944e-38, %v1575_v45  ;;  %vm1574_vm3 = vcmp.eq.f32.partialorder %v1573_v46, 8.507059e+37  ;;  %v1474_v61 = vpop.f32.mrf.mxu3 }
 0x61e   :  { %v4251_v35 = vpop.eup %4250 }
 0x61f   :  { %v4253_v36 = vpop.eup %4252  ;;  %v1563_v37 = vadd.f32 1.0, %v4251_v35 }
 0x620   :  { %v1565_v38 = vmul.f32 %v4253_v36, %v1562_v34  ;;  %vm1570_vm0 = vweird.f32 %v4253_v36 }
 0x621   :  { %4254 = vrcp.f32 %v1563_v37  ;;  %vm1571_vm2 = vmor %vm1569_vm1, %vm1570_vm0  ;;  %v1590_v51 = vand.u32 2147483648, %v1563_v37  ;;  %v1588_v55 = vand.u32 2147483647, %v1563_v37  ;;  %vm1584_vm5 = vweird.f32 %v1563_v37 }
 0x622   :  { %v1566_v39 = vsub.f32 1.0, %v1565_v38 }
 0x623   :  { %v1591_v58 = vor.u32 1.1754944e-38, %v1590_v51  ;;  %vm1589_vm7 = vcmp.eq.f32.partialorder %v1588_v55, 8.507059e+37 }
 0x624   :  { %v1567_v40 = vmul.f32 %v4253_v36, %v1566_v39 }
 0x626   :  { %v1568_v41 = vadd.f32 %v4253_v36, %v1567_v40 }
 0x627   :  { %v4255_v43 = vpop.eup %4254 }
 0x628   :  { %v1580_v47 = vmul.f32 %v4255_v43, %v1563_v37  ;;  %v1572_v48 = vsel %vm1571_vm2, %v4253_v36, %v1568_v41  ;;  %vm1585_vm4 = vweird.f32 %v4255_v43 }
 0x629   :  { %v1577_v56 = vsel %vm1574_vm3, %v1576_v50, %v1572_v48  ;;  %vm1586_vm6 = vmor %vm1584_vm5, %vm1585_vm4 }
 0x62a   :  { %v1581_v49 = vsub.f32 1.0, %v1580_v47  ;;  %v1594_v59 = vmul.f32 %v1577_v56, %v1472_v44 }
 0x62c   :  { %v1582_v52 = vmul.f32 %v4255_v43, %v1581_v49  ;;  %v4823_v2 = vadd.f32 %v1594_v59, %v1395_v63 }
 0x62e   :  { %v1583_v57 = vadd.f32 %v4255_v43, %v1582_v52 }
 0x630   :  { %v1587_v60 = vsel %vm1586_vm6, %v4255_v43, %v1583_v57 }
 0x631   :  { %v1592_v62 = vsel %vm1589_vm7, %v1591_v58, %v1587_v60  ;;  %v1598_v58 = vmul.f32 0.70710677, %v4823_v2 }
 0x632   :  { %v1595_v1 = vmul.f32 %v1592_v62, %v1474_v61 }
 0x634   :  { %v4825_v3 = vadd.f32 %v1595_v1, %v1396_v0  ;;  %v4102_v0 = vld [vmem:[#allocation17 + $0x78] sm:$0xff]  ;;  %v4101_v1 = vld [vmem:[#allocation17 + $0x70] sm:$0xff] }
 0x635   :  { %2078 = vmatpush.bf16.msra.mxu1 %v4102_v0 }
 0x636   :  { %v1600_v4 = vpack.c.bf16 %v4825_v3, %v4823_v2  ;;  %v1599_v59 = vmul.f32 0.70710677, %v4825_v3  ;;  %v4098_v2 = vld [vmem:[#allocation17 + $0x58] sm:$0xff]  ;;  %v4097_v3 = vld [vmem:[#allocation17 + $0x50] sm:$0xff] }
 0x638   :  { %1674 = vmatmul.bf16.vlgmr.msrb.gmra.mxu1 %v1600_v4  ;;  %1753 = vmatmul.bf16.vlgmr.msrb.gmra.mxu2 %v1600_v4  ;;  %v4100_v4 = vld [vmem:[#allocation17 + $0x68] sm:$0xff] }
 0x639   :  { %2079 = vmatpush.bf16.msra.mxu1 %v4101_v1 }
 0x63d   :  { %2080 = vmatpush.bf16.msra.mxu1 %v4100_v4 }
 0x641   :  { %2081 = vmatpush.bf16.msra.mxu1 %v4099_v5 }
 0x645   :  { %2082 = vmatpush.bf16.msra.mxu1 %v4098_v2 }
 0x649   :  { %2083 = vmatpush.bf16.msra.mxu1 %v4097_v3 }
 0x64d   :  { %2084 = vmatpush.bf16.msra.mxu1 %v4096_v10 }
 0x651   :  { %2085 = vmatpush.bf16.msra.mxu1 %v4095_v7 }
 0x6b5   :  { %v1675_v38 = vpop.f32.mrf.mxu1 }
 0x6bb   :  { %v1754_v19 = vpop.f32.mrf.mxu2 }
 0x6bc   :  { %v3563_v23 = vmul.f32 -1.442695, %v1754_v19 }
 0x6bd   :  { %v1677_v56 = vpop.f32.mrf.mxu1 }
 0x6be   :  { %4256 = vpow2.f32 %v3563_v23 }
 0x6c3   :  { %v1756_v26 = vpop.f32.mrf.mxu2 }
 0x6c4   :  { %v4257_v27 = vpop.eup %4256  ;;  %v3564_v28 = vmul.f32 -1.442695, %v1756_v26 }
 0x6c5   :  { %v1765_v29 = vadd.f32 1.0, %v4257_v27 }
 0x6c6   :  { %4258 = vpow2.f32 %v3564_v28 }
 0x6c7   :  { %4260 = vrcp.f32 %v1765_v29  ;;  %v1778_v39 = vand.u32 2147483648, %v1765_v29  ;;  %vm1772_vm9 = vweird.f32 %v1765_v29  ;;  %v1776_v41 = vand.u32 2147483647, %v1765_v29 }
 0x6c9   :  { %v1779_v45 = vor.u32 1.1754944e-38, %v1778_v39  ;;  %vm1777_vm12 = vcmp.eq.f32.partialorder %v1776_v41, 8.507059e+37 }
 0x6cc   :  { %v4259_v30 = vpop.eup %4258 }
 0x6cd   :  { %v4261_v31 = vpop.eup %4260  ;;  %v1766_v32 = vadd.f32 1.0, %v4259_v30 }
 0x6ce   :  { %v1768_v33 = vmul.f32 %v4261_v31, %v1765_v29  ;;  %vm1773_vm8 = vweird.f32 %v4261_v31 }
 0x6cf   :  { %4262 = vrcp.f32 %v1766_v32  ;;  %vm1774_vm10 = vmor %vm1772_vm9, %vm1773_vm8  ;;  %v1793_v46 = vand.u32 2147483648, %v1766_v32  ;;  %v1791_v48 = vand.u32 2147483647, %v1766_v32  ;;  %vm1787_vm13 = vweird.f32 %v1766_v32 }
 0x6d0   :  { %v1769_v34 = vsub.f32 1.0, %v1768_v33 }
 0x6d1   :  { %v1794_v51 = vor.u32 1.1754944e-38, %v1793_v46  ;;  %vm1792_vm15 = vcmp.eq.f32.partialorder %v1791_v48, 8.507059e+37 }
 0x6d2   :  { %v1770_v35 = vmul.f32 %v4261_v31, %v1769_v34 }
 0x6d4   :  { %v1771_v36 = vadd.f32 %v4261_v31, %v1770_v35 }
 0x6d5   :  { %v4263_v37 = vpop.eup %4262 }
 0x6d6   :  { %v1783_v40 = vmul.f32 %v4263_v37, %v1766_v32  ;;  %v1775_v44 = vsel %vm1774_vm10, %v4261_v31, %v1771_v36  ;;  %vm1788_vm11 = vweird.f32 %v4263_v37 }
 0x6d7   :  { %v1780_v49 = vsel %vm1777_vm12, %v1779_v45, %v1775_v44  ;;  %vm1789_vm14 = vmor %vm1787_vm13, %vm1788_vm11 }
 0x6d8   :  { %v1784_v43 = vsub.f32 1.0, %v1783_v40  ;;  %v1797_v55 = vmul.f32 %v1780_v49, %v1675_v38 }
 0x6da   :  { %v1785_v47 = vmul.f32 %v4263_v37, %v1784_v43  ;;  %v4831_v61 = vadd.f32 %v1797_v55, %v1598_v58 }
 0x6dc   :  { %v1786_v50 = vadd.f32 %v4263_v37, %v1785_v47  ;;  %v1801_v43 = vmul.f32 0.70710677, %v4831_v61 }
 0x6de   :  { %v1790_v52 = vsel %vm1789_vm14, %v4263_v37, %v1786_v50 }
 0x6df   :  { %v1795_v57 = vsel %vm1792_vm15, %v1794_v51, %v1790_v52 }
 0x6e0   :  { %v1798_v60 = vmul.f32 %v1795_v57, %v1677_v56 }
 0x6e2   :  { %v4833_v62 = vadd.f32 %v1798_v60, %v1599_v59 }
 0x6e4   :  { %v1803_v63 = vpack.c.bf16 %v4833_v62, %v4831_v61  ;;  %v1802_v44 = vmul.f32 0.70710677, %v4833_v62 }
 0x6e6   :  { %1877 = vmatmul.bf16.vlgmr.msrb.gmra.mxu3 %v1803_v63  ;;  %1956 = vmatmul.bf16.vlgmr.msra.gmra.mxu0 %v1803_v63 }
 0x763   :  { %v1957_v6 = vpop.f32.mrf.mxu0 }
 0x764   :  { %v3629_v9 = vmul.f32 -1.442695, %v1957_v6 }
 0x766   :  { %4264 = vpow2.f32 %v3629_v9 }
 0x769   :  { %v1878_v25 = vpop.f32.mrf.mxu3 }
 0x76b   :  { %v1959_v8 = vpop.f32.mrf.mxu0 }
 0x76c   :  { %v4265_v11 = vpop.eup %4264  ;;  %v3630_v12 = vmul.f32 -1.442695, %v1959_v8 }
 0x76d   :  { %v1968_v13 = vadd.f32 1.0, %v4265_v11 }
 0x76e   :  { %4266 = vpow2.f32 %v3630_v12 }
 0x76f   :  { %4268 = vrcp.f32 %v1968_v13  ;;  %v1981_v26 = vand.u32 2147483648, %v1968_v13  ;;  %vm1975_vm1 = vweird.f32 %v1968_v13  ;;  %v1979_v27 = vand.u32 2147483647, %v1968_v13 }
 0x771   :  { %v1982_v31 = vor.u32 1.1754944e-38, %v1981_v26  ;;  %vm1980_vm3 = vcmp.eq.f32.partialorder %v1979_v27, 8.507059e+37  ;;  %v1880_v40 = vpop.f32.mrf.mxu3  ;;  %v4110_v27 = vld [vmem:[#allocation5 + $0xb8] sm:$0xff] }
 0x772   :  { %2215 = vmatpush.bf16.msra.mxu2 %v4110_v27 }
 0x774   :  { %v4267_v14 = vpop.eup %4266 }
 0x775   :  { %v4269_v16 = vpop.eup %4268  ;;  %v1969_v18 = vadd.f32 1.0, %v4267_v14 }
 0x776   :  { %v1971_v19 = vmul.f32 %v4269_v16, %v1968_v13  ;;  %vm1976_vm0 = vweird.f32 %v4269_v16 }
 0x777   :  { %4270 = vrcp.f32 %v1969_v18  ;;  %vm1977_vm2 = vmor %vm1975_vm1, %vm1976_vm0  ;;  %v1996_v32 = vand.u32 2147483648, %v1969_v18  ;;  %v1994_v34 = vand.u32 2147483647, %v1969_v18  ;;  %vm1990_vm5 = vweird.f32 %v1969_v18 }
 0x778   :  { %v1972_v20 = vsub.f32 1.0, %v1971_v19 }
 0x779   :  { %v1997_v37 = vor.u32 1.1754944e-38, %v1996_v32  ;;  %vm1995_vm7 = vcmp.eq.f32.partialorder %v1994_v34, 8.507059e+37 }
 0x77a   :  { %v1973_v21 = vmul.f32 %v4269_v16, %v1972_v20 }
 0x77c   :  { %v1974_v23 = vadd.f32 %v4269_v16, %v1973_v21 }
 0x77d   :  { %v4271_v24 = vpop.eup %4270 }
 0x77e   :  { %v1986_v28 = vmul.f32 %v4271_v24, %v1969_v18  ;;  %v1978_v29 = vsel %vm1977_vm2, %v4269_v16, %v1974_v23  ;;  %vm1991_vm4 = vweird.f32 %v4271_v24  ;;  %v2008_v16 = vsub.f32 1.2, %v4807_v15  ;;  %v4109_v15 = vld [vmem:[#allocation5 + $0xb0] sm:$0xff] }
 0x77f   :  { %v1983_v35 = vsel %vm1980_vm3, %v1982_v31, %v1978_v29  ;;  %vm1992_vm6 = vmor %vm1990_vm5, %vm1991_vm4  ;;  %v4117_v29 = vld [vmem:[#allocation7 + $0xb0] sm:$0xff]  ;;  %2216 = vmatpush.bf16.msra.mxu2 %v4109_v15  ;;  %v4116_v31 = vld [vmem:[#allocation7 + $0xa8] sm:$0xff] }
 0x780   :  { %v1987_v30 = vsub.f32 1.0, %v1986_v28  ;;  %v2000_v38 = vmul.f32 %v1983_v35, %v1878_v25  ;;  %v2010_v20 = vmul.f32 %v4801_v42, %v2008_v16  ;;  %v4118_v28 = vld [vmem:[#allocation7 + $0xb8] sm:$0xff]  ;;  %v4127_v16 = vld [vmem:[#allocation10 + $0x80] sm:$0xff] }
 0x781   :  { %2294 = vmatpush.bf16.msra.mxu3 %v4118_v28 }
 0x782   :  { %v1988_v33 = vmul.f32 %v4271_v24, %v1987_v30  ;;  %v4839_v46 = vadd.f32 %v2000_v38, %v1801_v43  ;;  %v4108_v30 = vld [vmem:[#allocation5 + $0xa8] sm:$0xff]  ;;  %v4115_v43 = vld [vmem:[#allocation7 + $0xa0] sm:$0xff] }
 0x783   :  { %2217 = vmatpush.bf16.msra.mxu2 %v4108_v30 }
 0x784   :  { %v1989_v36 = vadd.f32 %v4271_v24, %v1988_v33 }
 0x785   :  { %2295 = vmatpush.bf16.msra.mxu3 %v4117_v29 }
 0x786   :  { %v1993_v39 = vsel %vm1992_vm6, %v4271_v24, %v1989_v36 }
 0x787   :  { %v1998_v41 = vsel %vm1995_vm7, %v1997_v37, %v1993_v39 }
 0x788   :  { %v2001_v45 = vmul.f32 %v1998_v41, %v1880_v40  ;;  %v4107_v41 = vld [vmem:[#allocation5 + $0xa0] sm:$0xff] }
 0x789   :  { %2296 = vmatpush.bf16.msra.mxu3 %v4116_v31  ;;  %2218 = vmatpush.bf16.msra.mxu2 %v4107_v41 }
 0x78a   :  { %v4841_v47 = vadd.f32 %v2001_v45, %v1802_v44  ;;  %v4106_v44 = vld [vmem:[#allocation5 + $0x98] sm:$0xff] }
 0x78b   :  { %v4114_v45 = vld [vmem:[#allocation7 + $0x98] sm:$0xff] }
 0x78c   :  { %v2012_v48 = vpack.c.bf16 %v4841_v47, %v4839_v46 }
 0x78d   :  { %2297 = vmatpush.bf16.msra.mxu3 %v4115_v43  ;;  %2219 = vmatpush.bf16.msra.mxu2 %v4106_v44 }
 0x78e   :  { %2086 = vmatmul.bf16.vlgmr.msra.gmra.mxu1 %v2012_v48  ;;  %v4105_v48 = vld [vmem:[#allocation5 + $0x90] sm:$0xff] }
 0x791   :  { %2298 = vmatpush.bf16.msra.mxu3 %v4114_v45  ;;  %2220 = vmatpush.bf16.msra.mxu2 %v4105_v48 }
 0x80b   :  { %v2087_v49 = vpop.f32.mrf.mxu1 }
 0x813   :  { %v2089_v50 = vpop.f32.mrf.mxu1 }
 0x814   :  { %v2092_v51 = vadd.f32 %v2089_v50, %v2087_v49 }
 0x816   :  { %v2093_v52 = vrot.slane %v2092_v51, 4 }
 0x818   :  { %v2094_v55 = vadd.f32 %v2093_v52, %v2092_v51  ;;  %v4112_v51 = vld [vmem:[#allocation7 + $0x88] sm:$0xff]  ;;  %v4103_v52 = vld [vmem:[#allocation5 + $0x80] sm:$0xff] }
 0x81a   :  { %v2095_v56 = vrot.slane %v2094_v55, 2 }
 0x81c   :  { %v2096_v57 = vadd.f32 %v2095_v56, %v2094_v55  ;;  %v4111_v55 = vld [vmem:[#allocation7 + $0x80] sm:$0xff] }
 0x81e   :  { %v2097_v58 = vrot.slane %v2096_v57, 1 }
 0x820   :  { %v2098_v59 = vadd.f32 %v2097_v58, %v2096_v57 }
 0x822   :  { %v2099_v60 = vmul.f32 %v2098_v59, %v4765_v22 }
 0x824   :  { %v2101_v61 = vsub.f32 %v2089_v50, %v2099_v60  ;;  %v2100_v62 = vsub.f32 %v2087_v49, %v2099_v60  ;;  %v4113_v49 = vld [vmem:[#allocation7 + $0x90] sm:$0xff]  ;;  %v4104_v50 = vld [vmem:[#allocation5 + $0x88] sm:$0xff] }
 0x825   :  { %2299 = vmatpush.bf16.msra.mxu3 %v4113_v49  ;;  %2221 = vmatpush.bf16.msra.mxu2 %v4104_v50  ;;  %v4142_v50 = vld [vmem:[#allocation11 + $0xb8] sm:$0xff] }
 0x826   :  { %v2103_v63 = vmul.f32 %v2101_v61, %v2101_v61  ;;  %v2102_v0 = vmul.f32 %v2100_v62, %v2100_v62 }
 0x828   :  { %v2104_v1 = vadd.f32 %v2103_v63, %v2102_v0  ;;  %v4126_v0 = vld [vmem:[#allocation8 + $0xb8] sm:$0xff] }
 0x829   :  { %2300 = vmatpush.bf16.msra.mxu3 %v4112_v51  ;;  %2222 = vmatpush.bf16.msra.mxu2 %v4103_v52  ;;  %v4150_v51 = vld [vmem:[#allocation13 + $0xb8] sm:$0xff]  ;;  %v4141_v52 = vld [vmem:[#allocation11 + $0xb0] sm:$0xff] }
 0x82a   :  { %v2105_v4 = vrot.slane %v2104_v1, 4  ;;  %2416 = vmatpush.bf16.msrb.mxu0 %v4126_v0  ;;  %v4136_v0 = vld [vmem:[#allocation11 + $0x88] sm:$0xff] }
 0x82c   :  { %v2106_v5 = vadd.f32 %v2105_v4, %v2104_v1  ;;  %v4134_v1 = vld [vmem:[#allocation10 + $0xb8] sm:$0xff]  ;;  %v4125_v4 = vld [vmem:[#allocation8 + $0xb0] sm:$0xff] }
 0x82d   :  { %2301 = vmatpush.bf16.msra.mxu3 %v4111_v55  ;;  %2495 = vmatpush.bf16.msrb.mxu1 %v4134_v1  ;;  %v4149_v55 = vld [vmem:[#allocation13 + $0xb0] sm:$0xff]  ;;  %v4144_v1 = vld [vmem:[#allocation13 + $0x88] sm:$0xff] }
 0x82e   :  { %v2107_v2 = vrot.slane %v2106_v5, 2  ;;  %2417 = vmatpush.bf16.msrb.mxu0 %v4125_v4  ;;  %2619 = vmatpush.bf16.msrb.mxu2 %v4142_v50  ;;  %v4162_v50 = vld [vmem:[#allocation16 + $0x98] sm:$0xff] }
 0x830   :  { %v2108_v3 = vadd.f32 %v2107_v2, %v2106_v5  ;;  %v4133_v5 = vld [vmem:[#allocation10 + $0xb0] sm:$0xff]  ;;  %v4124_v2 = vld [vmem:[#allocation8 + $0xa8] sm:$0xff] }
 0x831   :  { %2496 = vmatpush.bf16.msrb.mxu1 %v4133_v5  ;;  %2698 = vmatpush.bf16.msrb.mxu3 %v4150_v51  ;;  %v4135_v5 = vld [vmem:[#allocation11 + $0x80] sm:$0xff]  ;;  %v4153_v51 = vld [vmem:[#allocation14 + $0x90] sm:$0xff] }
 0x832   :  { %v2109_v6 = vrot.slane %v2108_v3, 1  ;;  %2418 = vmatpush.bf16.msrb.mxu0 %v4124_v2  ;;  %2620 = vmatpush.bf16.msrb.mxu2 %v4141_v52  ;;  %v4143_v2 = vld [vmem:[#allocation13 + $0x80] sm:$0xff]  ;;  %v4161_v52 = vld [vmem:[#allocation16 + $0x90] sm:$0xff] }
 0x834   :  { %v2110_v9 = vadd.f32 %v2109_v6, %v2108_v3  ;;  %v4132_v3 = vld [vmem:[#allocation10 + $0xa8] sm:$0xff]  ;;  %v4123_v6 = vld [vmem:[#allocation8 + $0xa0] sm:$0xff] }
 0x835   :  { %2497 = vmatpush.bf16.msrb.mxu1 %v4132_v3  ;;  %2699 = vmatpush.bf16.msrb.mxu3 %v4149_v55 }
 0x836   :  { %v2111_v10 = vmul.f32 %v2110_v9, %v4765_v22  ;;  %v2009_v22 = vsub.f32 1.2, %v4809_v17  ;;  %v4131_v9 = vld [vmem:[#allocation10 + $0xa0] sm:$0xff]  ;;  %2419 = vmatpush.bf16.msrb.mxu0 %v4123_v6 }
 0x838   :  { %v2112_v7 = vadd.f32 1e-05, %v2111_v10  ;;  %v2011_v25 = vmul.f32 %v4801_v42, %v2009_v22  ;;  %v4121_v10 = vld [vmem:[#allocation8 + $0x90] sm:$0xff] }
 0x839   :  { %2498 = vmatpush.bf16.msrb.mxu1 %v4131_v9 }
 0x83a   :  { %4272 = vrsqrt.f32 %v2112_v7  ;;  %vm2119_vm9 = vweird.f32 %v2112_v7 }
 0x840   :  { %v4273_v8 = vpop.eup %4272 }
 0x841   :  { %v2114_v11 = vmul.f32 %v4273_v8, %v2112_v7  ;;  %vm2120_vm8 = vweird.f32 %v4273_v8  ;;  %v4129_v7 = vld [vmem:[#allocation10 + $0x90] sm:$0xff] }
 0x842   :  { %vm2121_vm10 = vmor %vm2119_vm9, %vm2120_vm8 }
 0x843   :  { %v2115_v12 = vmul.f32 %v4273_v8, %v2114_v11  ;;  %v4128_v11 = vld [vmem:[#allocation10 + $0x88] sm:$0xff] }
 0x845   :  { %v2116_v13 = vmul.f32 0.5, %v2115_v12 }
 0x847   :  { %v2117_v14 = vsub.f32 1.5, %v2116_v13 }
 0x849   :  { %v2118_v18 = vmul.f32 %v4273_v8, %v2117_v14  ;;  %v4119_v14 = vld [vmem:[#allocation8 + $0x80] sm:$0xff] }
 0x84b   :  { %v2122_v19 = vsel %vm2121_vm10, %v4273_v8, %v2118_v18  ;;  %v4120_v8 = vld [vmem:[#allocation8 + $0x88] sm:$0xff] }
 0x84c   :  { %v2123_v21 = vmul.f32 %v2122_v19, %v2100_v62  ;;  %v2124_v24 = vmul.f32 %v2122_v19, %v2101_v61 }
 0x84e   :  { %v2125_v23 = vmul.f32 %v2123_v21, %v2010_v20  ;;  %v2126_v26 = vmul.f32 %v2124_v24, %v2011_v25 }
 0x850   :  { %2127 = vmax.xlane.f32.xlu2 %v2125_v23 }
 0x858   :  { %2129 = vmax.xlane.f32.xlu2 %v2126_v26 }
 0x8c3   :  { %v2128_v32 = vpop.xlane.xlu2 %2127 }
 0x8c4   :  { %v2131_v33 = vsub.f32 %v2125_v23, %v2128_v32 }
 0x8c6   :  { %v2133_v17 = vmul.f32 1.442695, %v2131_v33 }
 0x8c8   :  { %4274 = vpow2.f32 %v2133_v17 }
 0x8cb   :  { %v2130_v34 = vpop.xlane.xlu2 %2129 }
 0x8cc   :  { %v2132_v35 = vsub.f32 %v2126_v26, %v2130_v34 }
 0x8ce   :  { %v4275_v36 = vpop.eup %4274  ;;  %v2135_v37 = vmul.f32 1.442695, %v2132_v35 }
 0x8cf   :  { %v2137_v38 = vmul.f32 %v4275_v36, %v4801_v42 }
 0x8d0   :  { %4276 = vpow2.f32 %v2135_v37 }
 0x8d1   :  { %2139 = vadd.xlane.f32.xlu0 %v2137_v38 }
 0x8d6   :  { %v4277_v39 = vpop.eup %4276 }
 0x8d7   :  { %v2138_v40 = vmul.f32 %v4277_v39, %v4801_v42 }
 0x8d9   :  { %2141 = vadd.xlane.f32.xlu1 %v2138_v40 }
 0x944   :  { %v2140_v42 = vpop.xlane.xlu0 %2139 }
 0x945   :  { %4278 = vrcp.f32 %v2140_v42  ;;  %v4140_v42 = vld [vmem:[#allocation11 + $0xa8] sm:$0xff] }
 0x946   :  { %2621 = vmatpush.bf16.msrb.mxu2 %v4140_v42 }
 0x94b   :  { %v4279_v57 = vpop.eup %4278 }
 0x94c   :  { %v2142_v56 = vpop.xlane.xlu1 %2141  ;;  %v2145_v58 = vmul.f32 %v4279_v57, %v2137_v38  ;;  %v4139_v57 = vld [vmem:[#allocation11 + $0xa0] sm:$0xff] }
 0x94d   :  { %4280 = vrcp.f32 %v2142_v56  ;;  %v4148_v56 = vld [vmem:[#allocation13 + $0xa8] sm:$0xff]  ;;  %2622 = vmatpush.bf16.msrb.mxu2 %v4139_v57 }
 0x94e   :  { %v2147_v61 = vmul.f32 %v2145_v58, %v4769_v53  ;;  %v4122_v53 = vld [vmem:[#allocation8 + $0x98] sm:$0xff]  ;;  %2700 = vmatpush.bf16.msrb.mxu3 %v4148_v56  ;;  %v4147_v58 = vld [vmem:[#allocation13 + $0xa0] sm:$0xff]  ;;  %v4152_v56 = vld [vmem:[#allocation14 + $0x88] sm:$0xff] }
 0x94f   :  { %2420 = vmatpush.bf16.msrb.mxu0 %v4122_v53  ;;  %v4160_v57 = vld [vmem:[#allocation16 + $0x88] sm:$0xff] }
 0x952   :  { %2701 = vmatpush.bf16.msrb.mxu3 %v4147_v58  ;;  %v4151_v58 = vld [vmem:[#allocation14 + $0x80] sm:$0xff] }
 0x953   :  { %v4281_v59 = vpop.eup %4280  ;;  %2421 = vmatpush.bf16.msrb.mxu0 %v4121_v10 }
 0x954   :  { %v2146_v60 = vmul.f32 %v4281_v59, %v2138_v40  ;;  %v4138_v59 = vld [vmem:[#allocation11 + $0x98] sm:$0xff] }
 0x955   :  { %2623 = vmatpush.bf16.msrb.mxu2 %v4138_v59  ;;  %v4159_v59 = vld [vmem:[#allocation16 + $0x80] sm:$0xff] }
 0x956   :  { %v2148_v62 = vmul.f32 %v2146_v60, %v4771_v54  ;;  %v4130_v54 = vld [vmem:[#allocation10 + $0x98] sm:$0xff] }
 0x957   :  { %2499 = vmatpush.bf16.msrb.mxu1 %v4130_v54  ;;  %2422 = vmatpush.bf16.msrb.mxu0 %v4120_v8  ;;  %v4146_v60 = vld [vmem:[#allocation13 + $0x98] sm:$0xff] }
 0x958   :  { %v2149_v63 = vpack.c.bf16 %v2148_v62, %v2147_v61  ;;  %2702 = vmatpush.bf16.msrb.mxu3 %v4146_v60  ;;  %v4137_v61 = vld [vmem:[#allocation11 + $0x90] sm:$0xff] }
 0x959   :  { %v4145_v62 = vld [vmem:[#allocation13 + $0x90] sm:$0xff]  ;;  %2624 = vmatpush.bf16.msrb.mxu2 %v4137_v61 }
 0x95a   :  { %2223 = vmatmul.bf16.vlgmr.msra.gmra.mxu2 %v2149_v63  ;;  %2302 = vmatmul.bf16.vlgmr.msra.gmra.mxu3 %v2149_v63 }
 0x95b   :  { %2500 = vmatpush.bf16.msrb.mxu1 %v4129_v7  ;;  %2423 = vmatpush.bf16.msrb.mxu0 %v4119_v14 }
 0x95c   :  { %2703 = vmatpush.bf16.msrb.mxu3 %v4145_v62 }
 0x95d   :  { %2625 = vmatpush.bf16.msrb.mxu2 %v4136_v0 }
 0x95f   :  { %2501 = vmatpush.bf16.msrb.mxu1 %v4128_v11 }
 0x960   :  { %2704 = vmatpush.bf16.msrb.mxu3 %v4144_v1 }
 0x961   :  { %2626 = vmatpush.bf16.msrb.mxu2 %v4135_v5 }
 0x963   :  { %2502 = vmatpush.bf16.msrb.mxu1 %v4127_v16 }
 0x964   :  { %2705 = vmatpush.bf16.msrb.mxu3 %v4143_v2 }
 0x9dd   :  { %v2303_v12 = vpop.f32.mrf.mxu3  ;;  %v2224_v15 = vpop.f32.mrf.mxu2 }
 0x9de   :  { %v3727_v13 = vmul.f32 -1.442695, %v2303_v12 }
 0x9e0   :  { %4282 = vpow2.f32 %v3727_v13 }
 0x9e5   :  { %v2305_v18 = vpop.f32.mrf.mxu3  ;;  %v2226_v43 = vpop.f32.mrf.mxu2 }
 0x9e6   :  { %v4283_v19 = vpop.eup %4282  ;;  %v3728_v20 = vmul.f32 -1.442695, %v2305_v18 }
 0x9e7   :  { %v2314_v21 = vadd.f32 1.0, %v4283_v19 }
 0x9e8   :  { %4284 = vpow2.f32 %v3728_v20 }
 0x9e9   :  { %4286 = vrcp.f32 %v2314_v21  ;;  %v2327_v31 = vand.u32 2147483648, %v2314_v21  ;;  %vm2321_vm12 = vweird.f32 %v2314_v21  ;;  %v2325_v33 = vand.u32 2147483647, %v2314_v21 }
 0x9eb   :  { %v2328_v37 = vor.u32 1.1754944e-38, %v2327_v31  ;;  %vm2326_vm0 = vcmp.eq.f32.partialorder %v2325_v33, 8.507059e+37 }
 0x9ee   :  { %v4285_v23 = vpop.eup %4284 }
 0x9ef   :  { %v4287_v22 = vpop.eup %4286  ;;  %v2315_v24 = vadd.f32 1.0, %v4285_v23 }
 0x9f0   :  { %v2317_v25 = vmul.f32 %v4287_v22, %v2314_v21  ;;  %vm2322_vm11 = vweird.f32 %v4287_v22 }
 0x9f1   :  { %4288 = vrcp.f32 %v2315_v24  ;;  %v2342_v17 = vand.u32 2147483648, %v2315_v24  ;;  %vm2323_vm13 = vmor %vm2321_vm12, %vm2322_vm11  ;;  %v2340_v36 = vand.u32 2147483647, %v2315_v24  ;;  %vm2336_vm15 = vweird.f32 %v2315_v24 }
 0x9f2   :  { %v2318_v26 = vsub.f32 1.0, %v2317_v25 }
 0x9f3   :  { %v2343_v40 = vor.u32 1.1754944e-38, %v2342_v17  ;;  %vm2341_vm2 = vcmp.eq.f32.partialorder %v2340_v36, 8.507059e+37 }
 0x9f4   :  { %v2319_v27 = vmul.f32 %v4287_v22, %v2318_v26 }
 0x9f6   :  { %v2320_v30 = vadd.f32 %v4287_v22, %v2319_v27 }
 0x9f7   :  { %v4289_v28 = vpop.eup %4288 }
 0x9f8   :  { %v2332_v29 = vmul.f32 %v4289_v28, %v2315_v24  ;;  %v2324_v35 = vsel %vm2323_vm13, %v4287_v22, %v2320_v30  ;;  %vm2337_vm14 = vweird.f32 %v4289_v28 }
 0x9f9   :  { %v2329_v39 = vsel %vm2326_vm0, %v2328_v37, %v2324_v35  ;;  %vm2338_vm1 = vmor %vm2336_vm15, %vm2337_vm14 }
 0x9fa   :  { %v2333_v32 = vsub.f32 1.0, %v2332_v29  ;;  %v4855_v45 = vmul.f32 %v2329_v39, %v2224_v15  ;;  %v4166_v39 = vld [vmem:[#allocation16 + $0xb8] sm:$0xff] }
 0x9fb   :  { %2901 = vmatpush.bf16.msra.mxu1 %v4166_v39  ;;  %v4167_v39 = vld [vmem:[#allocation19] sm:$0xff] }
 0x9fc   :  { %v2334_v34 = vmul.f32 %v4289_v28, %v2333_v32  ;;  %v2348_v33 = vmul.f32 0.70710677, %v4855_v45 }
 0x9fe   :  { %v2335_v38 = vadd.f32 %v4289_v28, %v2334_v34 }
 0xa00   :  { %v2339_v41 = vsel %vm2338_vm1, %v4289_v28, %v2335_v38  ;;  %v4158_v38 = vld [vmem:[#allocation14 + $0xb8] sm:$0xff] }
 0xa01   :  { %v2344_v44 = vsel %vm2341_vm2, %v2343_v40, %v2339_v41  ;;  %2822 = vmatpush.bf16.msra.mxu0 %v4158_v38  ;;  %v4157_v40 = vld [vmem:[#allocation14 + $0xb0] sm:$0xff] }
 0xa02   :  { %v4857_v48 = vmul.f32 %v2344_v44, %v2226_v43  ;;  %v4165_v41 = vld [vmem:[#allocation16 + $0xb0] sm:$0xff]  ;;  %v4156_v43 = vld [vmem:[#allocation14 + $0xa8] sm:$0xff] }
 0xa03   :  { %2902 = vmatpush.bf16.msra.mxu1 %v4165_v41  ;;  %v4164_v44 = vld [vmem:[#allocation16 + $0xa8] sm:$0xff] }
 0xa04   :  { %v2350_v49 = vpack.c.bf16 %v4857_v48, %v4855_v45  ;;  %v2349_v17 = vmul.f32 0.70710677, %v4857_v48  ;;  %v4155_v45 = vld [vmem:[#allocation14 + $0xa0] sm:$0xff] }
 0xa05   :  { %2823 = vmatpush.bf16.msra.mxu0 %v4157_v40  ;;  %v4163_v48 = vld [vmem:[#allocation16 + $0xa0] sm:$0xff] }
 0xa06   :  { %2424 = vmatmul.bf16.vlgmr.msrb.gmra.mxu0 %v2350_v49  ;;  %2503 = vmatmul.bf16.vlgmr.msrb.gmra.mxu1 %v2350_v49  ;;  %v4154_v49 = vld [vmem:[#allocation14 + $0x98] sm:$0xff] }
 0xa07   :  { %2903 = vmatpush.bf16.msra.mxu1 %v4164_v44 }
 0xa09   :  { %2824 = vmatpush.bf16.msra.mxu0 %v4156_v43 }
 0xa0b   :  { %2904 = vmatpush.bf16.msra.mxu1 %v4163_v48 }
 0xa0d   :  { %2825 = vmatpush.bf16.msra.mxu0 %v4155_v45 }
 0xa0f   :  { %2905 = vmatpush.bf16.msra.mxu1 %v4162_v50 }
 0xa11   :  { %2826 = vmatpush.bf16.msra.mxu0 %v4154_v49 }
 0xa13   :  { %2906 = vmatpush.bf16.msra.mxu1 %v4161_v52 }
 0xa15   :  { %2827 = vmatpush.bf16.msra.mxu0 %v4153_v51 }
 0xa17   :  { %2907 = vmatpush.bf16.msra.mxu1 %v4160_v57 }
 0xa19   :  { %2828 = vmatpush.bf16.msra.mxu0 %v4152_v56 }
 0xa1b   :  { %2908 = vmatpush.bf16.msra.mxu1 %v4159_v59 }
 0xa1d   :  { %2829 = vmatpush.bf16.msra.mxu0 %v4151_v58 }
 0xa83   :  { %v2504_v63 = vpop.f32.mrf.mxu1  ;;  %v2425_v16 = vpop.f32.mrf.mxu0 }
 0xa84   :  { %v3793_v4 = vmul.f32 -1.442695, %v2504_v63 }
 0xa86   :  { %4290 = vpow2.f32 %v3793_v4 }
 0xa8b   :  { %v2506_v3 = vpop.f32.mrf.mxu1  ;;  %v2427_v31 = vpop.f32.mrf.mxu0 }
 0xa8c   :  { %v4291_v6 = vpop.eup %4290  ;;  %v3794_v9 = vmul.f32 -1.442695, %v2506_v3 }
 0xa8d   :  { %v2515_v53 = vadd.f32 1.0, %v4291_v6 }
 0xa8e   :  { %4292 = vpow2.f32 %v3794_v9 }
 0xa8f   :  { %4294 = vrcp.f32 %v2515_v53  ;;  %v2528_v18 = vand.u32 2147483648, %v2515_v53  ;;  %vm2522_vm4 = vweird.f32 %v2515_v53  ;;  %v2526_v20 = vand.u32 2147483647, %v2515_v53 }
 0xa91   :  { %v2529_v22 = vor.u32 1.1754944e-38, %v2528_v18  ;;  %vm2527_vm7 = vcmp.eq.f32.partialorder %v2526_v20, 8.507059e+37 }
 0xa94   :  { %v4293_v54 = vpop.eup %4292 }
 0xa95   :  { %v4295_v10 = vpop.eup %4294  ;;  %v2516_v7 = vadd.f32 1.0, %v4293_v54 }
 0xa96   :  { %v2518_v8 = vmul.f32 %v4295_v10, %v2515_v53  ;;  %vm2523_vm3 = vweird.f32 %v4295_v10 }
 0xa97   :  { %4296 = vrcp.f32 %v2516_v7  ;;  %vm2524_vm5 = vmor %vm2522_vm4, %vm2523_vm3  ;;  %v2543_v24 = vand.u32 2147483648, %v2516_v7  ;;  %v2541_v26 = vand.u32 2147483647, %v2516_v7  ;;  %vm2537_vm8 = vweird.f32 %v2516_v7 }
 0xa98   :  { %v2519_v11 = vsub.f32 1.0, %v2518_v8 }
 0xa99   :  { %v2544_v15 = vor.u32 1.1754944e-38, %v2543_v24  ;;  %vm2542_vm10 = vcmp.eq.f32.partialorder %v2541_v26, 8.507059e+37 }
 0xa9a   :  { %v2520_v12 = vmul.f32 %v4295_v10, %v2519_v11 }
 0xa9c   :  { %v2521_v13 = vadd.f32 %v4295_v10, %v2520_v12 }
 0xa9d   :  { %v4297_v14 = vpop.eup %4296 }
 0xa9e   :  { %v2533_v19 = vmul.f32 %v4297_v14, %v2516_v7  ;;  %v2525_v23 = vsel %vm2524_vm5, %v4295_v10, %v2521_v13  ;;  %vm2538_vm6 = vweird.f32 %v4297_v14 }
 0xa9f   :  { %v2530_v27 = vsel %vm2527_vm7, %v2529_v22, %v2525_v23  ;;  %vm2539_vm9 = vmor %vm2537_vm8, %vm2538_vm6 }
 0xaa0   :  { %v2534_v21 = vsub.f32 1.0, %v2533_v19  ;;  %v2547_v30 = vmul.f32 %v2530_v27, %v2425_v16 }
 0xaa2   :  { %v2535_v25 = vmul.f32 %v4297_v14, %v2534_v21  ;;  %v4863_v35 = vadd.f32 %v2547_v30, %v2348_v33  ;;  %v4174_v30 = vld [vmem:[#allocation19 + $0x38] sm:$0xff]  ;;  %v4171_v33 = vld [vmem:[#allocation19 + $0x20] sm:$0xff] }
 0xaa3   :  { %3030 = vmatpush.bf16.msra.mxu2 %v4174_v30 }
 0xaa4   :  { %v2536_v28 = vadd.f32 %v4297_v14, %v2535_v25  ;;  %v2551_v25 = vmul.f32 0.70710677, %v4863_v35 }
 0xaa6   :  { %v2540_v29 = vsel %vm2539_vm9, %v4297_v14, %v2536_v28 }
 0xaa7   :  { %v2545_v32 = vsel %vm2542_vm10, %v2544_v15, %v2540_v29 }
 0xaa8   :  { %v2548_v34 = vmul.f32 %v2545_v32, %v2427_v31  ;;  %v4173_v31 = vld [vmem:[#allocation19 + $0x30] sm:$0xff]  ;;  %v4172_v32 = vld [vmem:[#allocation19 + $0x28] sm:$0xff] }
 0xaa9   :  { %3031 = vmatpush.bf16.msra.mxu2 %v4173_v31 }
 0xaaa   :  { %v4865_v36 = vadd.f32 %v2548_v34, %v2349_v17  ;;  %v4170_v17 = vld [vmem:[#allocation19 + $0x18] sm:$0xff] }
 0xaac   :  { %v2553_v37 = vpack.c.bf16 %v4865_v36, %v4863_v35  ;;  %v2552_v26 = vmul.f32 0.70710677, %v4865_v36  ;;  %v4169_v36 = vld [vmem:[#allocation19 + $0x10] sm:$0xff] }
 0xaad   :  { %3032 = vmatpush.bf16.msra.mxu2 %v4172_v32 }
 0xaae   :  { %2627 = vmatmul.bf16.vlgmr.msrb.gmra.mxu2 %v2553_v37  ;;  %2706 = vmatmul.bf16.vlgmr.msrb.gmra.mxu3 %v2553_v37  ;;  %v4168_v37 = vld [vmem:[#allocation19 + $0x8] sm:$0xff] }
 0xab1   :  { %3033 = vmatpush.bf16.msra.mxu2 %v4171_v33 }
 0xab5   :  { %3034 = vmatpush.bf16.msra.mxu2 %v4170_v17 }
 0xab9   :  { %3035 = vmatpush.bf16.msra.mxu2 %v4169_v36 }
 0xabd   :  { %3036 = vmatpush.bf16.msra.mxu2 %v4168_v37 }
 0xac1   :  { %3037 = vmatpush.bf16.msra.mxu2 %v4167_v39 }
 0xb31   :  { %v2707_v55 = vpop.f32.mrf.mxu3  ;;  %v2628_v53 = vpop.f32.mrf.mxu2 }
 0xb32   :  { %v3859_v42 = vmul.f32 -1.442695, %v2707_v55 }
 0xb34   :  { %4298 = vpow2.f32 %v3859_v42 }
 0xb39   :  { %v2709_v60 = vpop.f32.mrf.mxu3  ;;  %v2630_v22 = vpop.f32.mrf.mxu2 }
 0xb3a   :  { %v4299_v61 = vpop.eup %4298  ;;  %v3860_v62 = vmul.f32 -1.442695, %v2709_v60 }
 0xb3b   :  { %v2718_v63 = vadd.f32 1.0, %v4299_v61 }
 0xb3c   :  { %4300 = vpow2.f32 %v3860_v62 }
 0xb3d   :  { %4302 = vrcp.f32 %v2718_v63  ;;  %v2731_v54 = vand.u32 2147483648, %v2718_v63  ;;  %vm2725_vm12 = vweird.f32 %v2718_v63  ;;  %v2729_v7 = vand.u32 2147483647, %v2718_v63 }
 0xb3f   :  { %v2732_v12 = vor.u32 1.1754944e-38, %v2731_v54  ;;  %vm2730_vm15 = vcmp.eq.f32.partialorder %v2729_v7, 8.507059e+37 }
 0xb42   :  { %v4301_v0 = vpop.eup %4300 }
 0xb43   :  { %v4303_v1 = vpop.eup %4302  ;;  %v2719_v4 = vadd.f32 1.0, %v4301_v0 }
 0xb44   :  { %v2721_v5 = vmul.f32 %v4303_v1, %v2718_v63  ;;  %vm2726_vm11 = vweird.f32 %v4303_v1 }
 0xb45   :  { %4304 = vrcp.f32 %v2719_v4  ;;  %vm2727_vm13 = vmor %vm2725_vm12, %vm2726_vm11  ;;  %v2746_v13 = vand.u32 2147483648, %v2719_v4  ;;  %v2744_v16 = vand.u32 2147483647, %v2719_v4  ;;  %vm2740_vm0 = vweird.f32 %v2719_v4 }
 0xb46   :  { %v2722_v2 = vsub.f32 1.0, %v2721_v5 }
 0xb47   :  { %v2747_v20 = vor.u32 1.1754944e-38, %v2746_v13  ;;  %vm2745_vm2 = vcmp.eq.f32.partialorder %v2744_v16, 8.507059e+37 }
 0xb48   :  { %v2723_v3 = vmul.f32 %v4303_v1, %v2722_v2 }
 0xb4a   :  { %v2724_v6 = vadd.f32 %v4303_v1, %v2723_v3  ;;  %v2004_v3 = vmax.f32 %v4839_v46, 0.0  ;;  %v4193_v46 = vld [vmem:[%s4897_s11] ss:$0 sm:$0xff] }
 0xb4b   :  { %v4305_v9 = vpop.eup %4304 }
 0xb4c   :  { %v2736_v10 = vmul.f32 %v4305_v9, %v2719_v4  ;;  %v2728_v11 = vsel %vm2727_vm13, %v4303_v1, %v2724_v6  ;;  %vm2741_vm14 = vweird.f32 %v4305_v9 }
 0xb4d   :  { %v2733_v18 = vsel %vm2730_vm15, %v2732_v12, %v2728_v11  ;;  %vm2742_vm1 = vmor %vm2740_vm0, %vm2741_vm14 }
 0xb4e   :  { %v2737_v8 = vsub.f32 1.0, %v2736_v10  ;;  %v2750_v23 = vmul.f32 %v2733_v18, %v2628_v53 }
 0xb50   :  { %v2738_v14 = vmul.f32 %v4305_v9, %v2737_v8  ;;  %v2752_v28 = vadd.f32 %v2750_v23, %v2551_v25 }
 0xb52   :  { %v2739_v19 = vadd.f32 %v4305_v9, %v2738_v14  ;;  %v2754_v62 = vmul.f32 0.70710677, %v2752_v28  ;;  %v2005_v14 = vmax.f32 %v4841_v47, 0.0 }
 0xb54   :  { %v2743_v21 = vsel %vm2742_vm1, %v4305_v9, %v2739_v19 }
 0xb55   :  { %v2748_v24 = vsel %vm2745_vm2, %v2747_v20, %v2743_v21 }
 0xb56   :  { %v2751_v27 = vmul.f32 %v2748_v24, %v2630_v22 }
 0xb58   :  { %v4871_v15 = vadd.f32 %v2751_v27, %v2552_v26 }
 0xb5a   :  { %v2756_v29 = vpack.c.bf16 %v4871_v15, %v2752_v28  ;;  %v2755_v11 = vmul.f32 0.70710677, %v4871_v15 }
 0xb5c   :  { %2830 = vmatmul.bf16.vlgmr.msra.gmra.mxu0 %v2756_v29  ;;  %2909 = vmatmul.bf16.vlgmr.msra.gmra.mxu1 %v2756_v29 }
 0xbd9   :  { %v2910_v34 = vpop.f32.mrf.mxu1  ;;  %v2831_v57 = vpop.f32.mrf.mxu0 }
 0xbda   :  { %v3925_v35 = vmul.f32 -1.442695, %v2910_v34 }
 0xbdc   :  { %4306 = vpow2.f32 %v3925_v35 }
 0xbe1   :  { %v2912_v38 = vpop.f32.mrf.mxu1  ;;  %v2833_v7 = vpop.f32.mrf.mxu0 }
 0xbe2   :  { %v4307_v40 = vpop.eup %4306  ;;  %v3926_v41 = vmul.f32 -1.442695, %v2912_v38 }
 0xbe3   :  { %v2921_v43 = vadd.f32 1.0, %v4307_v40 }
 0xbe4   :  { %4308 = vpow2.f32 %v3926_v41 }
 0xbe5   :  { %4310 = vrcp.f32 %v2921_v43  ;;  %v2934_v51 = vand.u32 2147483648, %v2921_v43  ;;  %v2932_v55 = vand.u32 2147483647, %v2921_v43  ;;  %vm2928_vm4 = vweird.f32 %v2921_v43 }
 0xbe7   :  { %v2935_v58 = vor.u32 1.1754944e-38, %v2934_v51  ;;  %vm2933_vm6 = vcmp.eq.f32.partialorder %v2932_v55, 8.507059e+37 }
 0xbea   :  { %v4309_v44 = vpop.eup %4308 }
 0xbeb   :  { %v4311_v45 = vpop.eup %4310  ;;  %v2922_v48 = vadd.f32 1.0, %v4309_v44 }
 0xbec   :  { %v2924_v49 = vmul.f32 %v4311_v45, %v2921_v43  ;;  %vm2929_vm3 = vweird.f32 %v4311_v45 }
 0xbed   :  { %4312 = vrcp.f32 %v2922_v48  ;;  %vm2930_vm5 = vmor %vm2928_vm4, %vm2929_vm3  ;;  %v2949_v1 = vand.u32 2147483648, %v2922_v48  ;;  %v2947_v5 = vand.u32 2147483647, %v2922_v48  ;;  %vm2943_vm8 = vweird.f32 %v2922_v48 }
 0xbee   :  { %v2925_v50 = vsub.f32 1.0, %v2924_v49 }
 0xbef   :  { %v2950_v53 = vor.u32 1.1754944e-38, %v2949_v1  ;;  %vm2948_vm10 = vcmp.eq.f32.partialorder %v2947_v5, 8.507059e+37 }
 0xbf0   :  { %v2926_v52 = vmul.f32 %v4311_v45, %v2925_v50 }
 0xbf2   :  { %v2927_v42 = vadd.f32 %v4311_v45, %v2926_v52 }
 0xbf3   :  { %v4313_v56 = vpop.eup %4312 }
 0xbf4   :  { %v2939_v59 = vmul.f32 %v4313_v56, %v2922_v48  ;;  %v2931_v60 = vsel %vm2930_vm5, %v4311_v45, %v2927_v42  ;;  %vm2944_vm7 = vweird.f32 %v4313_v56 }
 0xbf5   :  { %v2936_v61 = vsel %vm2933_vm6, %v2935_v58, %v2931_v60  ;;  %vm2945_vm9 = vmor %vm2943_vm8, %vm2944_vm7 }
 0xbf6   :  { %v2940_v63 = vsub.f32 1.0, %v2939_v59  ;;  %v2953_v0 = vmul.f32 %v2936_v61, %v2831_v57 }
 0xbf8   :  { %v2941_v4 = vmul.f32 %v4313_v56, %v2940_v63  ;;  %v2955_v2 = vadd.f32 %v2953_v0, %v2754_v62 }
 0xbfa   :  { %v2942_v6 = vadd.f32 %v4313_v56, %v2941_v4  ;;  %v2957_v9 = vmax.f32 %v2955_v2, 0.0 }
 0xbfc   :  { %v2946_v54 = vsel %vm2945_vm9, %v4313_v56, %v2942_v6  ;;  %v2959_v10 = vadd.f32 %v2957_v9, %v2004_v3 }
 0xbfd   :  { %v2951_v8 = vsel %vm2948_vm10, %v2950_v53, %v2946_v54 }
 0xbfe   :  { %v2954_v12 = vmul.f32 %v2951_v8, %v2833_v7 }
 0xc00   :  { %v2956_v13 = vadd.f32 %v2954_v12, %v2755_v11 }
 0xc02   :  { %v2958_v16 = vmax.f32 %v2956_v13, 0.0 }
 0xc04   :  { %v2960_v18 = vadd.f32 %v2958_v16, %v2005_v14 }
 0xc06   :  { %v2961_v19 = vpack.c.bf16 %v2960_v18, %v2959_v10 }
 0xc08   :  { %3038 = vmatmul.bf16.vlgmr.msra.gmra.mxu2 %v2961_v19 }
 0xc8b   :  { %v3039_v20 = vpop.f32.mrf.mxu2 }
 0xc8c   :  { %v3040_v21 = vadd.f32 %v4193_v46, %v3039_v20 }
 0xc8e   :  { %3044 = vst [vmem:[#allocation20] sm:$0xff] %v3040_v21 }
 0xc93   :  { %v3041_v23 = vpop.f32.mrf.mxu2 }
 0xc94   :  { %v3042_v22 = vadd.f32 %v4193_v46, %v3041_v23 }
 0xc96   :  { %3045 = vst [vmem:[#allocation20 + $0x8] sm:$0xff] %v3042_v22 }
 0xc97   :  { %3058 = dma.vmem_to_hbm [thread:$0]  %s3051_s16, 256, %s3053_s17, [#allocation4], %s4624_s14, %s4624_s14, %s4625_s15  }
 0xc98   :  { %4614 = dma.done.wait [#allocation4], 256  }
 0xc99   :  { %4615 = vsyncadd [#allocation4], 4294967040 }
 0xc9a   :  { %3063 = vsyncpa [#allocation3], 1 }
 0xc9b   :  { %3064 = vsyncpa [#allocation6], 1 }
 0xc9c   :  { %3065 = vsyncpa [#allocation9], 1 }
 0xc9d   :  { %3066 = vsyncpa [#allocation12], 1 }
 0xc9e   :  { %3067 = vsyncpa [#allocation15], 1 }
 0xc9f   :  { %3068 = vsyncpa [#allocation18], 1 }
 0xca0   :  { %3069 = vsyncpa [#allocation4], 1 }

</bundles_post_ra>
